<compile_context>
chip_gen: v5e
topology: v5e:2x2
jax: 0.10.0
libtpu: 0.0.40
codegen_flags: <defaults>
</compile_context>

<pallas_src>
import functools

import jax
import jax.numpy as jnp
import numpy as np
from jax import lax
from jax.experimental import pallas as pl
from jax.experimental.pallas import tpu as pltpu

EPS = 1e-5


# --------------------------------------------------------------------------
# Fused Pallas kernel: the entire ConvBlock forward in one invocation.
# Layout inside the kernel: rows = (n, h), lanes = (channel, w).
# --------------------------------------------------------------------------
def _conv_block_kernel(*refs, n, h, w, downsample):
    if downsample:
        (x_ref, g1_ref, b1_ref, w1_ref, g2_ref, b2_ref, w2_ref,
         g3_ref, b3_ref, w3_ref, gd_ref, bd_ref, wd_ref, o_ref) = refs
    else:
        (x_ref, g1_ref, b1_ref, w1_ref, g2_ref, b2_ref, w2_ref,
         g3_ref, b3_ref, w3_ref, o_ref) = refs

    nh = n * h
    inv_m = 1.0 / float(n * h * w)

    def is_pow2(d):
        return (d & (d - 1)) == 0

    # Channel-fold matrix P[i, j] = 1 iff lanes i, j carry the same channel
    # (lane = channel*W + w).  (1, C*W) @ P both folds the W replicas and
    # broadcasts the per-channel result back into lane space on the MXU.
    def chan_fold(wc):
        r = lax.broadcasted_iota(jnp.int32, (wc, wc), 0)
        c = lax.broadcasted_iota(jnp.int32, (wc, wc), 1)
        if is_pow2(w):
            sh = int(w).bit_length() - 1
            r, c = jnp.right_shift(r, sh), jnp.right_shift(c, sh)
        else:  # non-power-of-two width fallback
            r, c = r // w, c // w
        return (r == c).astype(jnp.float32)

    def stats(y, p):
        s1 = jnp.sum(y, axis=0, keepdims=True)                 # (1, C*W)
        s2 = jnp.sum(y * y, axis=0, keepdims=True)             # (1, C*W)
        mean = jnp.dot(s1, p, preferred_element_type=jnp.float32) * inv_m
        ex2 = jnp.dot(s2, p, preferred_element_type=jnp.float32) * inv_m
        return mean, ex2 - mean * mean                         # biased var

    def bn_relu(y, mean, var, g_ref, b_ref):
        scale = g_ref[...] * lax.rsqrt(var + EPS)              # (1, C*W)
        shift = b_ref[...] - mean * scale
        return jnp.maximum(y * scale + shift, 0.0)

    rows = lax.broadcasted_iota(jnp.int32, (nh, 1), 0)
    h_idx = jnp.bitwise_and(rows, h - 1) if is_pow2(h) else rows % h
    top_row = h_idx == 0            # h == 0     -> nothing above
    bot_row = h_idx == h - 1        # h == H - 1 -> nothing below

    def conv3x3(y, wk_ref):
        """y: (N*H, C*W);  wk_ref: (3, C*W, Cout*W) banded weights (per ky).

        ky taps = sublane rolls (XLU) + boundary masks; kx taps + W-padding are
        baked into the banded weights, so the conv is 3 lane-dense matmuls."""
        up = jnp.where(top_row, 0.0, pltpu.roll(y, shift=1, axis=0))
        dn = jnp.where(bot_row, 0.0, pltpu.roll(y, shift=nh - 1, axis=0))
        acc = jnp.dot(up, wk_ref[0], preferred_element_type=jnp.float32)
        acc += jnp.dot(y, wk_ref[1], preferred_element_type=jnp.float32)
        acc += jnp.dot(dn, wk_ref[2], preferred_element_type=jnp.float32)
        return acc

    x2 = x_ref[...]                                            # (N*H, Cin*W)
    mean_x, var_x = stats(x2, chan_fold(x2.shape[1]))

    out1 = conv3x3(bn_relu(x2, mean_x, var_x, g1_ref, b1_ref), w1_ref)
    m1, v1 = stats(out1, chan_fold(out1.shape[1]))
    out2 = conv3x3(bn_relu(out1, m1, v1, g2_ref, b2_ref), w2_ref)
    m2, v2 = stats(out2, chan_fold(out2.shape[1]))
    out3 = conv3x3(bn_relu(out2, m2, v2, g3_ref, b3_ref), w3_ref)

    if downsample:
        # The downsample BN sees the same input tensor -> reuse x's batch stats.
        yd = bn_relu(x2, mean_x, var_x, gd_ref, bd_ref)
        residual = jnp.dot(yd, wd_ref[...], preferred_element_type=jnp.float32)
    else:
        residual = x2                                          # Cin == out_planes

    out = jnp.concatenate([out1, out2, out3], axis=-1) + residual
    o_ref[...] = out.astype(o_ref.dtype)                       # (N*H, out*W)


# --------------------------------------------------------------------------
# Wrapper
# --------------------------------------------------------------------------
def conv_block_forward(x_nhwc, p):
    """Pallas ConvBlock.forward. x_nhwc: (N,H,W,Cin) f32 -> (N,H,W,out_planes)."""
    N, H, W, Cin = x_nhwc.shape
    c1 = p["w1"].shape[-1]
    c2 = p["w2"].shape[-1]
    out_planes = c1 + 2 * c2
    has_ds = "wd" in p
    if not has_ds:
        assert Cin == out_planes, "identity residual requires Cin == out_planes"

    # Lane-dense channel-major layout: lane index = channel * W + w.
    x2 = jnp.transpose(x_nhwc, (0, 1, 3, 2)).reshape(N * H, Cin * W)

    def tile_vec(v):                       # (C,) -> (1, C*W), per-channel tiled
        return jnp.repeat(v, W).reshape(1, v.shape[0] * W)

    # kx placement matrix: S[kx, w_in, w_out] = 1 iff w_in == w_out + kx - 1.
    S = np.zeros((3, W, W), np.float32)
    for kx in range(3):
        for wo in range(W):
            wi = wo + kx - 1
            if 0 <= wi < W:
                S[kx, wi, wo] = 1.0
    S = jnp.asarray(S)

    def banded(k):                         # (3,3,C,Co) -> (3, C*W, Co*W)
        C, Co = k.shape[2], k.shape[3]
        b = jnp.einsum("kio,ykcd->ycido", S, k)
        return b.reshape(3, C * W, Co * W)

    inputs = [
        x2,
        tile_vec(p["g1"]), tile_vec(p["b1"]), banded(p["w1"]),
        tile_vec(p["g2"]), tile_vec(p["b2"]), banded(p["w2"]),
        tile_vec(p["g3"]), tile_vec(p["b3"]), banded(p["w3"]),
    ]
    if has_ds:
        eye = jnp.eye(W, dtype=jnp.float32)
        bd = jnp.einsum("cd,io->cido", p["wd"], eye)
        inputs += [tile_vec(p["gd"]), tile_vec(p["bd"]),
                   bd.reshape(Cin * W, out_planes * W)]

    def full_spec(shape):
        nd = len(shape)
        return pl.BlockSpec(tuple(shape), lambda i, _nd=nd: (0,) * _nd)

    out2d = pl.pallas_call(
        functools.partial(_conv_block_kernel, n=N, h=H, w=W, downsample=has_ds),
        out_shape=jax.ShapeDtypeStruct((N * H, out_planes * W), x_nhwc.dtype),
        grid_spec=pltpu.PrefetchScalarGridSpec(
            num_scalar_prefetch=0,
            grid=(1,),
            in_specs=[full_spec(a.shape) for a in inputs],
            out_specs=full_spec((N * H, out_planes * W)),
        ),
        compiler_params=pltpu.CompilerParams(
            dimension_semantics=("arbitrary",)),
    )(*inputs)

    # (N*H, out*W) with lane=(channel, w)  ->  NHWC, outside the kernel.
    return jnp.transpose(out2d.reshape(N, H, out_planes, W), (0, 1, 3, 2))


# --------------------------------------------------------------------------
# Pure-JAX reference (correctness check only)
# --------------------------------------------------------------------------
def _ref_bn_relu(x, gamma, beta):
    mean = jnp.mean(x, axis=(0, 1, 2))
    var = jnp.var(x, axis=(0, 1, 2))                 # biased, training mode
    return jnp.maximum((x - mean) / jnp.sqrt(var + EPS) * gamma + beta, 0.0)


def _ref_conv3x3(x, w):
    return lax.conv_general_dilated(
        x, w, window_strides=(1, 1), padding=((1, 1), (1, 1)),
        dimension_numbers=("NHWC", "HWIO", "NHWC"))


def ref_forward(x_nhwc, p):
    out1 = _ref_conv3x3(_ref_bn_relu(x_nhwc, p["g1"], p["b1"]), p["w1"])
    out2 = _ref_conv3x3(_ref_bn_relu(out1, p["g2"], p["b2"]), p["w2"])
    out3 = _ref_conv3x3(_ref_bn_relu(out2, p["g3"], p["b3"]), p["w3"])
    out = jnp.concatenate([out1, out2, out3], axis=-1)
    if "wd" in p:
        residual = jnp.einsum(
            "nhwc,cd->nhwd", _ref_bn_relu(x_nhwc, p["gd"], p["bd"]), p["wd"])
    else:
        residual = x_nhwc
    return out + residual


# --------------------------------------------------------------------------
# Main
# --------------------------------------------------------------------------
if __name__ == "__main__":
    key = jax.random.PRNGKey(0)
    N, H, W = 2, 16, 16

    def w_init(k, shape, fan_in):
        return jax.random.normal(k, shape, jnp.float32) * (1.0 / np.sqrt(fan_in))

    def make_params(k, in_planes, out_planes):
        c1, c2 = out_planes // 2, out_planes // 4
        ks = jax.random.split(k, 12)
        p = {
            "g1": 1.0 + 0.1 * jax.random.normal(ks[0], (in_planes,), jnp.float32),
            "b1": 0.1 * jax.random.normal(ks[1], (in_planes,), jnp.float32),
            "w1": w_init(ks[2], (3, 3, in_planes, c1), 9 * in_planes),
            "g2": 1.0 + 0.1 * jax.random.normal(ks[3], (c1,), jnp.float32),
            "b2": 0.1 * jax.random.normal(ks[4], (c1,), jnp.float32),
            "w2": w_init(ks[5], (3, 3, c1, c2), 9 * c1),
            "g3": 1.0 + 0.1 * jax.random.normal(ks[6], (c2,), jnp.float32),
            "b3": 0.1 * jax.random.normal(ks[7], (c2,), jnp.float32),
            "w3": w_init(ks[8], (3, 3, c2, c2), 9 * c2),
        }
        if in_planes != out_planes:   # downsample: BN + ReLU + 1x1 conv
            p["gd"] = 1.0 + 0.1 * jax.random.normal(ks[9], (in_planes,), jnp.float32)
            p["bd"] = 0.1 * jax.random.normal(ks[10], (in_planes,), jnp.float32)
            p["wd"] = w_init(ks[11], (in_planes, out_planes), in_planes)
        return p

    k1, k2, kx1, kx2 = jax.random.split(key, 4)

    # Case 1: in_planes != out_planes -> downsample branch active.
    in_planes, out_planes = 8, 16
    x_nchw = jax.random.normal(kx1, (N, in_planes, H, W), jnp.float32)
    x_nhwc = jnp.transpose(x_nchw, (0, 2, 3, 1))
    p1 = make_params(k1, in_planes, out_planes)
    out = jax.block_until_ready(conv_block_forward(x_nhwc, p1))
    ref = jax.block_until_ready(ref_forward(x_nhwc, p1))
    assert out.shape == (N, H, W, out_planes), out.shape
    np.testing.assert_allclose(np.asarray(out), np.asarray(ref),
                               rtol=1e-4, atol=1e-4)

    # Case 2: in_planes == out_planes -> identity residual.
    in_planes = out_planes = 16
    x_nhwc2 = jnp.transpose(
        jax.random.normal(kx2, (N, in_planes, H, W), jnp.float32), (0, 2, 3, 1))
    p2 = make_params(k2, in_planes, out_planes)
    out2 = jax.block_until_ready(conv_block_forward(x_nhwc2, p2))
    ref2 = jax.block_until_ready(ref_forward(x_nhwc2, p2))
    assert out2.shape == (N, H, W, out_planes), out2.shape
    np.testing.assert_allclose(np.asarray(out2), np.asarray(ref2),
                               rtol=1e-4, atol=1e-4)

    print("KERNEL_OK")
</pallas_src>

<mosaic_0001>
module attributes {stable_mosaic.version = 11 : i64} {
  func.func @_conv_block_kernel(%arg0: i32, %arg1: memref<32x128xf32, #tpu.memory_space<vmem>>, %arg2: memref<1x128xf32, #tpu.memory_space<vmem>>, %arg3: memref<1x128xf32, #tpu.memory_space<vmem>>, %arg4: memref<3x128x128xf32, #tpu.memory_space<vmem>>, %arg5: memref<1x128xf32, #tpu.memory_space<vmem>>, %arg6: memref<1x128xf32, #tpu.memory_space<vmem>>, %arg7: memref<3x128x64xf32, #tpu.memory_space<vmem>>, %arg8: memref<1x64xf32, #tpu.memory_space<vmem>>, %arg9: memref<1x64xf32, #tpu.memory_space<vmem>>, %arg10: memref<3x64x64xf32, #tpu.memory_space<vmem>>, %arg11: memref<1x128xf32, #tpu.memory_space<vmem>>, %arg12: memref<1x128xf32, #tpu.memory_space<vmem>>, %arg13: memref<128x256xf32, #tpu.memory_space<vmem>>, %arg14: memref<32x256xf32, #tpu.memory_space<vmem>>) attributes {dimension_semantics = [#tpu.dimension_semantics<arbitrary>], iteration_bounds = array<i64: 1>, scalar_prefetch = 0 : i64, scratch_operands = 0 : i64, tpu.core_type = #tpu.core_type<tc>, window_params = [{pipeline_mode = #tpu.pipeline_mode<synchronous>, transform_indices = @transform_0, window_bounds = array<i64: 32, 128>}, {pipeline_mode = #tpu.pipeline_mode<synchronous>, transform_indices = @transform_1, window_bounds = array<i64: 1, 128>}, {pipeline_mode = #tpu.pipeline_mode<synchronous>, transform_indices = @transform_2, window_bounds = array<i64: 1, 128>}, {pipeline_mode = #tpu.pipeline_mode<synchronous>, transform_indices = @transform_3, window_bounds = array<i64: 3, 128, 128>}, {pipeline_mode = #tpu.pipeline_mode<synchronous>, transform_indices = @transform_4, window_bounds = array<i64: 1, 128>}, {pipeline_mode = #tpu.pipeline_mode<synchronous>, transform_indices = @transform_5, window_bounds = array<i64: 1, 128>}, {pipeline_mode = #tpu.pipeline_mode<synchronous>, transform_indices = @transform_6, window_bounds = array<i64: 3, 128, 64>}, {pipeline_mode = #tpu.pipeline_mode<synchronous>, transform_indices = @transform_7, window_bounds = array<i64: 1, 64>}, {pipeline_mode = #tpu.pipeline_mode<synchronous>, transform_indices = @transform_8, window_bounds = array<i64: 1, 64>}, {pipeline_mode = #tpu.pipeline_mode<synchronous>, transform_indices = @transform_9, window_bounds = array<i64: 3, 64, 64>}, {pipeline_mode = #tpu.pipeline_mode<synchronous>, transform_indices = @transform_10, window_bounds = array<i64: 1, 128>}, {pipeline_mode = #tpu.pipeline_mode<synchronous>, transform_indices = @transform_11, window_bounds = array<i64: 1, 128>}, {pipeline_mode = #tpu.pipeline_mode<synchronous>, transform_indices = @transform_12, window_bounds = array<i64: 128, 256>}, {pipeline_mode = #tpu.pipeline_mode<synchronous>, transform_indices = @transform_13, window_bounds = array<i64: 32, 256>}]} {
    %0 = tpu.iota {dimensions = array<i32: 0>} : vector<32x1xi32>
    %c15_i32 = arith.constant 15 : i32
    %1 = vector.broadcast %c15_i32 : i32 to vector<32x1xi32>
    %2 = arith.andi %0, %1 : vector<32x1xi32>
    %c0_i32 = arith.constant 0 : i32
    %3 = vector.broadcast %c0_i32 : i32 to vector<32x1xi32>
    %4 = arith.cmpi eq, %2, %3 : vector<32x1xi32>
    %c15_i32_0 = arith.constant 15 : i32
    %5 = vector.broadcast %c15_i32_0 : i32 to vector<32x1xi32>
    %6 = arith.cmpi eq, %2, %5 : vector<32x1xi32>
    %c0 = arith.constant 0 : index
    %c0_1 = arith.constant 0 : index
    %7 = vector.load %arg1[%c0, %c0_1] : memref<32x128xf32, #tpu.memory_space<vmem>>, vector<32x128xf32>
    %8 = tpu.iota {dimensions = array<i32: 0>} : vector<128x128xi32>
    %9 = tpu.iota {dimensions = array<i32: 1>} : vector<128x128xi32>
    %c4_i32 = arith.constant 4 : i32
    %10 = vector.broadcast %c4_i32 : i32 to vector<128x128xi32>
    %11 = arith.shrsi %8, %10 : vector<128x128xi32>
    %c4_i32_2 = arith.constant 4 : i32
    %12 = vector.broadcast %c4_i32_2 : i32 to vector<128x128xi32>
    %13 = arith.shrsi %9, %12 : vector<128x128xi32>
    %14 = arith.cmpi eq, %11, %13 : vector<128x128xi32>
    %15 = arith.extui %14 : vector<128x128xi1> to vector<128x128xi32>
    %16 = arith.sitofp %15 : vector<128x128xi32> to vector<128x128xf32>
    %cst = arith.constant dense<0.000000e+00> : vector<128xf32>
    %17 = vector.multi_reduction <add>, %7, %cst [0] : vector<32x128xf32> to vector<128xf32>
    %18 = vector.shape_cast %17 : vector<128xf32> to vector<1x128xf32>
    %19 = arith.mulf %7, %7 : vector<32x128xf32>
    %cst_3 = arith.constant dense<0.000000e+00> : vector<128xf32>
    %20 = vector.multi_reduction <add>, %19, %cst_3 [0] : vector<32x128xf32> to vector<128xf32>
    %21 = vector.shape_cast %20 : vector<128xf32> to vector<1x128xf32>
    %cst_4 = arith.constant dense<0.000000e+00> : vector<1x128xf32>
    %22 = tpu.matmul %18, %16, %cst_4 {dimension_numbers = #tpu.dot_dimension_numbers<[1], [0], [0], [1], [0, 0, 1, 1], [], []>} : vector<1x128xf32>, vector<128x128xf32>, vector<1x128xf32> -> vector<1x128xf32>
    %cst_5 = arith.constant 0.001953125 : f32
    %23 = vector.broadcast %cst_5 : f32 to vector<1x128xf32>
    %24 = arith.mulf %22, %23 : vector<1x128xf32>
    %cst_6 = arith.constant dense<0.000000e+00> : vector<1x128xf32>
    %25 = tpu.matmul %21, %16, %cst_6 {dimension_numbers = #tpu.dot_dimension_numbers<[1], [0], [0], [1], [0, 0, 1, 1], [], []>} : vector<1x128xf32>, vector<128x128xf32>, vector<1x128xf32> -> vector<1x128xf32>
    %cst_7 = arith.constant 0.001953125 : f32
    %26 = vector.broadcast %cst_7 : f32 to vector<1x128xf32>
    %27 = arith.mulf %25, %26 : vector<1x128xf32>
    %28 = arith.mulf %24, %24 : vector<1x128xf32>
    %29 = arith.subf %27, %28 : vector<1x128xf32>
    %c0_8 = arith.constant 0 : index
    %c0_9 = arith.constant 0 : index
    %30 = vector.load %arg2[%c0_8, %c0_9] : memref<1x128xf32, #tpu.memory_space<vmem>>, vector<1x128xf32>
    %cst_10 = arith.constant 9.99999974E-6 : f32
    %31 = vector.broadcast %cst_10 : f32 to vector<1x128xf32>
    %32 = arith.addf %29, %31 : vector<1x128xf32>
    %33 = math.rsqrt %32 : vector<1x128xf32>
    %34 = arith.mulf %30, %33 : vector<1x128xf32>
    %c0_11 = arith.constant 0 : index
    %c0_12 = arith.constant 0 : index
    %35 = vector.load %arg3[%c0_11, %c0_12] : memref<1x128xf32, #tpu.memory_space<vmem>>, vector<1x128xf32>
    %36 = arith.mulf %24, %34 : vector<1x128xf32>
    %37 = arith.subf %35, %36 : vector<1x128xf32>
    %38 = vector.broadcast %34 : vector<1x128xf32> to vector<32x128xf32>
    %39 = arith.mulf %7, %38 : vector<32x128xf32>
    %40 = vector.broadcast %37 : vector<1x128xf32> to vector<32x128xf32>
    %41 = arith.addf %39, %40 : vector<32x128xf32>
    %cst_13 = arith.constant 0.000000e+00 : f32
    %42 = vector.broadcast %cst_13 : f32 to vector<32x128xf32>
    %43 = arith.maximumf %41, %42 : vector<32x128xf32>
    %c1_i32 = arith.constant 1 : i32
    %44 = tpu.dynamic_rotate %43 by %c1_i32 dim 0 : vector<32x128xf32>, i32 -> vector<32x128xf32>
    %cst_14 = arith.constant 0.000000e+00 : f32
    %45 = vector.shape_cast %4 : vector<32x1xi1> to vector<32x1xi1>
    %46 = vector.broadcast %45 : vector<32x1xi1> to vector<32x128xi1>
    %47 = vector.broadcast %cst_14 : f32 to vector<32x128xf32>
    %48 = arith.select %46, %47, %44 : vector<32x128xi1>, vector<32x128xf32>
    %c31_i32 = arith.constant 31 : i32
    %49 = tpu.dynamic_rotate %43 by %c31_i32 dim 0 : vector<32x128xf32>, i32 -> vector<32x128xf32>
    %cst_15 = arith.constant 0.000000e+00 : f32
    %50 = vector.shape_cast %6 : vector<32x1xi1> to vector<32x1xi1>
    %51 = vector.broadcast %50 : vector<32x1xi1> to vector<32x128xi1>
    %52 = vector.broadcast %cst_15 : f32 to vector<32x128xf32>
    %53 = arith.select %51, %52, %49 : vector<32x128xi1>, vector<32x128xf32>
    %c0_16 = arith.constant 0 : index
    %c0_17 = arith.constant 0 : index
    %c0_18 = arith.constant 0 : index
    %54 = vector.load %arg4[%c0_16, %c0_17, %c0_18] : memref<3x128x128xf32, #tpu.memory_space<vmem>>, vector<1x128x128xf32>
    %55 = vector.shape_cast %54 : vector<1x128x128xf32> to vector<128x128xf32>
    %cst_19 = arith.constant dense<0.000000e+00> : vector<32x128xf32>
    %56 = tpu.matmul %48, %55, %cst_19 {dimension_numbers = #tpu.dot_dimension_numbers<[1], [0], [0], [1], [0, 0, 1, 1], [], []>} : vector<32x128xf32>, vector<128x128xf32>, vector<32x128xf32> -> vector<32x128xf32>
    %c1 = arith.constant 1 : index
    %c0_20 = arith.constant 0 : index
    %c0_21 = arith.constant 0 : index
    %57 = vector.load %arg4[%c1, %c0_20, %c0_21] : memref<3x128x128xf32, #tpu.memory_space<vmem>>, vector<1x128x128xf32>
    %58 = vector.shape_cast %57 : vector<1x128x128xf32> to vector<128x128xf32>
    %cst_22 = arith.constant dense<0.000000e+00> : vector<32x128xf32>
    %59 = tpu.matmul %43, %58, %cst_22 {dimension_numbers = #tpu.dot_dimension_numbers<[1], [0], [0], [1], [0, 0, 1, 1], [], []>} : vector<32x128xf32>, vector<128x128xf32>, vector<32x128xf32> -> vector<32x128xf32>
    %60 = arith.addf %56, %59 : vector<32x128xf32>
    %c2 = arith.constant 2 : index
    %c0_23 = arith.constant 0 : index
    %c0_24 = arith.constant 0 : index
    %61 = vector.load %arg4[%c2, %c0_23, %c0_24] : memref<3x128x128xf32, #tpu.memory_space<vmem>>, vector<1x128x128xf32>
    %62 = vector.shape_cast %61 : vector<1x128x128xf32> to vector<128x128xf32>
    %cst_25 = arith.constant dense<0.000000e+00> : vector<32x128xf32>
    %63 = tpu.matmul %53, %62, %cst_25 {dimension_numbers = #tpu.dot_dimension_numbers<[1], [0], [0], [1], [0, 0, 1, 1], [], []>} : vector<32x128xf32>, vector<128x128xf32>, vector<32x128xf32> -> vector<32x128xf32>
    %64 = arith.addf %60, %63 : vector<32x128xf32>
    %65 = tpu.iota {dimensions = array<i32: 0>} : vector<128x128xi32>
    %66 = tpu.iota {dimensions = array<i32: 1>} : vector<128x128xi32>
    %c4_i32_26 = arith.constant 4 : i32
    %67 = vector.broadcast %c4_i32_26 : i32 to vector<128x128xi32>
    %68 = arith.shrsi %65, %67 : vector<128x128xi32>
    %c4_i32_27 = arith.constant 4 : i32
    %69 = vector.broadcast %c4_i32_27 : i32 to vector<128x128xi32>
    %70 = arith.shrsi %66, %69 : vector<128x128xi32>
    %71 = arith.cmpi eq, %68, %70 : vector<128x128xi32>
    %72 = arith.extui %71 : vector<128x128xi1> to vector<128x128xi32>
    %73 = arith.sitofp %72 : vector<128x128xi32> to vector<128x128xf32>
    %cst_28 = arith.constant dense<0.000000e+00> : vector<128xf32>
    %74 = vector.multi_reduction <add>, %64, %cst_28 [0] : vector<32x128xf32> to vector<128xf32>
    %75 = vector.shape_cast %74 : vector<128xf32> to vector<1x128xf32>
    %76 = arith.mulf %64, %64 : vector<32x128xf32>
    %cst_29 = arith.constant dense<0.000000e+00> : vector<128xf32>
    %77 = vector.multi_reduction <add>, %76, %cst_29 [0] : vector<32x128xf32> to vector<128xf32>
    %78 = vector.shape_cast %77 : vector<128xf32> to vector<1x128xf32>
    %cst_30 = arith.constant dense<0.000000e+00> : vector<1x128xf32>
    %79 = tpu.matmul %75, %73, %cst_30 {dimension_numbers = #tpu.dot_dimension_numbers<[1], [0], [0], [1], [0, 0, 1, 1], [], []>} : vector<1x128xf32>, vector<128x128xf32>, vector<1x128xf32> -> vector<1x128xf32>
    %cst_31 = arith.constant 0.001953125 : f32
    %80 = vector.broadcast %cst_31 : f32 to vector<1x128xf32>
    %81 = arith.mulf %79, %80 : vector<1x128xf32>
    %cst_32 = arith.constant dense<0.000000e+00> : vector<1x128xf32>
    %82 = tpu.matmul %78, %73, %cst_32 {dimension_numbers = #tpu.dot_dimension_numbers<[1], [0], [0], [1], [0, 0, 1, 1], [], []>} : vector<1x128xf32>, vector<128x128xf32>, vector<1x128xf32> -> vector<1x128xf32>
    %cst_33 = arith.constant 0.001953125 : f32
    %83 = vector.broadcast %cst_33 : f32 to vector<1x128xf32>
    %84 = arith.mulf %82, %83 : vector<1x128xf32>
    %85 = arith.mulf %81, %81 : vector<1x128xf32>
    %86 = arith.subf %84, %85 : vector<1x128xf32>
    %c0_34 = arith.constant 0 : index
    %c0_35 = arith.constant 0 : index
    %87 = vector.load %arg5[%c0_34, %c0_35] : memref<1x128xf32, #tpu.memory_space<vmem>>, vector<1x128xf32>
    %cst_36 = arith.constant 9.99999974E-6 : f32
    %88 = vector.broadcast %cst_36 : f32 to vector<1x128xf32>
    %89 = arith.addf %86, %88 : vector<1x128xf32>
    %90 = math.rsqrt %89 : vector<1x128xf32>
    %91 = arith.mulf %87, %90 : vector<1x128xf32>
    %c0_37 = arith.constant 0 : index
    %c0_38 = arith.constant 0 : index
    %92 = vector.load %arg6[%c0_37, %c0_38] : memref<1x128xf32, #tpu.memory_space<vmem>>, vector<1x128xf32>
    %93 = arith.mulf %81, %91 : vector<1x128xf32>
    %94 = arith.subf %92, %93 : vector<1x128xf32>
    %95 = vector.broadcast %91 : vector<1x128xf32> to vector<32x128xf32>
    %96 = arith.mulf %64, %95 : vector<32x128xf32>
    %97 = vector.broadcast %94 : vector<1x128xf32> to vector<32x128xf32>
    %98 = arith.addf %96, %97 : vector<32x128xf32>
    %cst_39 = arith.constant 0.000000e+00 : f32
    %99 = vector.broadcast %cst_39 : f32 to vector<32x128xf32>
    %100 = arith.maximumf %98, %99 : vector<32x128xf32>
    %c1_i32_40 = arith.constant 1 : i32
    %101 = tpu.dynamic_rotate %100 by %c1_i32_40 dim 0 : vector<32x128xf32>, i32 -> vector<32x128xf32>
    %cst_41 = arith.constant 0.000000e+00 : f32
    %102 = vector.shape_cast %4 : vector<32x1xi1> to vector<32x1xi1>
    %103 = vector.broadcast %102 : vector<32x1xi1> to vector<32x128xi1>
    %104 = vector.broadcast %cst_41 : f32 to vector<32x128xf32>
    %105 = arith.select %103, %104, %101 : vector<32x128xi1>, vector<32x128xf32>
    %c31_i32_42 = arith.constant 31 : i32
    %106 = tpu.dynamic_rotate %100 by %c31_i32_42 dim 0 : vector<32x128xf32>, i32 -> vector<32x128xf32>
    %cst_43 = arith.constant 0.000000e+00 : f32
    %107 = vector.shape_cast %6 : vector<32x1xi1> to vector<32x1xi1>
    %108 = vector.broadcast %107 : vector<32x1xi1> to vector<32x128xi1>
    %109 = vector.broadcast %cst_43 : f32 to vector<32x128xf32>
    %110 = arith.select %108, %109, %106 : vector<32x128xi1>, vector<32x128xf32>
    %c0_44 = arith.constant 0 : index
    %c0_45 = arith.constant 0 : index
    %c0_46 = arith.constant 0 : index
    %111 = vector.load %arg7[%c0_44, %c0_45, %c0_46] : memref<3x128x64xf32, #tpu.memory_space<vmem>>, vector<1x128x64xf32>
    %112 = vector.shape_cast %111 : vector<1x128x64xf32> to vector<128x64xf32>
    %cst_47 = arith.constant dense<0.000000e+00> : vector<32x64xf32>
    %113 = tpu.matmul %105, %112, %cst_47 {dimension_numbers = #tpu.dot_dimension_numbers<[1], [0], [0], [1], [0, 0, 1, 1], [], []>} : vector<32x128xf32>, vector<128x64xf32>, vector<32x64xf32> -> vector<32x64xf32>
    %c1_48 = arith.constant 1 : index
    %c0_49 = arith.constant 0 : index
    %c0_50 = arith.constant 0 : index
    %114 = vector.load %arg7[%c1_48, %c0_49, %c0_50] : memref<3x128x64xf32, #tpu.memory_space<vmem>>, vector<1x128x64xf32>
    %115 = vector.shape_cast %114 : vector<1x128x64xf32> to vector<128x64xf32>
    %cst_51 = arith.constant dense<0.000000e+00> : vector<32x64xf32>
    %116 = tpu.matmul %100, %115, %cst_51 {dimension_numbers = #tpu.dot_dimension_numbers<[1], [0], [0], [1], [0, 0, 1, 1], [], []>} : vector<32x128xf32>, vector<128x64xf32>, vector<32x64xf32> -> vector<32x64xf32>
    %117 = arith.addf %113, %116 : vector<32x64xf32>
    %c2_52 = arith.constant 2 : index
    %c0_53 = arith.constant 0 : index
    %c0_54 = arith.constant 0 : index
    %118 = vector.load %arg7[%c2_52, %c0_53, %c0_54] : memref<3x128x64xf32, #tpu.memory_space<vmem>>, vector<1x128x64xf32>
    %119 = vector.shape_cast %118 : vector<1x128x64xf32> to vector<128x64xf32>
    %cst_55 = arith.constant dense<0.000000e+00> : vector<32x64xf32>
    %120 = tpu.matmul %110, %119, %cst_55 {dimension_numbers = #tpu.dot_dimension_numbers<[1], [0], [0], [1], [0, 0, 1, 1], [], []>} : vector<32x128xf32>, vector<128x64xf32>, vector<32x64xf32> -> vector<32x64xf32>
    %121 = arith.addf %117, %120 : vector<32x64xf32>
    %122 = tpu.iota {dimensions = array<i32: 0>} : vector<64x64xi32>
    %123 = tpu.iota {dimensions = array<i32: 1>} : vector<64x64xi32>
    %c4_i32_56 = arith.constant 4 : i32
    %124 = vector.broadcast %c4_i32_56 : i32 to vector<64x64xi32>
    %125 = arith.shrsi %122, %124 : vector<64x64xi32>
    %c4_i32_57 = arith.constant 4 : i32
    %126 = vector.broadcast %c4_i32_57 : i32 to vector<64x64xi32>
    %127 = arith.shrsi %123, %126 : vector<64x64xi32>
    %128 = arith.cmpi eq, %125, %127 : vector<64x64xi32>
    %129 = arith.extui %128 : vector<64x64xi1> to vector<64x64xi32>
    %130 = arith.sitofp %129 : vector<64x64xi32> to vector<64x64xf32>
    %cst_58 = arith.constant dense<0.000000e+00> : vector<64xf32>
    %131 = vector.multi_reduction <add>, %121, %cst_58 [0] : vector<32x64xf32> to vector<64xf32>
    %132 = vector.shape_cast %131 : vector<64xf32> to vector<1x64xf32>
    %133 = arith.mulf %121, %121 : vector<32x64xf32>
    %cst_59 = arith.constant dense<0.000000e+00> : vector<64xf32>
    %134 = vector.multi_reduction <add>, %133, %cst_59 [0] : vector<32x64xf32> to vector<64xf32>
    %135 = vector.shape_cast %134 : vector<64xf32> to vector<1x64xf32>
    %cst_60 = arith.constant dense<0.000000e+00> : vector<1x64xf32>
    %136 = tpu.matmul %132, %130, %cst_60 {dimension_numbers = #tpu.dot_dimension_numbers<[1], [0], [0], [1], [0, 0, 1, 1], [], []>} : vector<1x64xf32>, vector<64x64xf32>, vector<1x64xf32> -> vector<1x64xf32>
    %cst_61 = arith.constant 0.001953125 : f32
    %137 = vector.broadcast %cst_61 : f32 to vector<1x64xf32>
    %138 = arith.mulf %136, %137 : vector<1x64xf32>
    %cst_62 = arith.constant dense<0.000000e+00> : vector<1x64xf32>
    %139 = tpu.matmul %135, %130, %cst_62 {dimension_numbers = #tpu.dot_dimension_numbers<[1], [0], [0], [1], [0, 0, 1, 1], [], []>} : vector<1x64xf32>, vector<64x64xf32>, vector<1x64xf32> -> vector<1x64xf32>
    %cst_63 = arith.constant 0.001953125 : f32
    %140 = vector.broadcast %cst_63 : f32 to vector<1x64xf32>
    %141 = arith.mulf %139, %140 : vector<1x64xf32>
    %142 = arith.mulf %138, %138 : vector<1x64xf32>
    %143 = arith.subf %141, %142 : vector<1x64xf32>
    %c0_64 = arith.constant 0 : index
    %c0_65 = arith.constant 0 : index
    %144 = vector.load %arg8[%c0_64, %c0_65] : memref<1x64xf32, #tpu.memory_space<vmem>>, vector<1x64xf32>
    %cst_66 = arith.constant 9.99999974E-6 : f32
    %145 = vector.broadcast %cst_66 : f32 to vector<1x64xf32>
    %146 = arith.addf %143, %145 : vector<1x64xf32>
    %147 = math.rsqrt %146 : vector<1x64xf32>
    %148 = arith.mulf %144, %147 : vector<1x64xf32>
    %c0_67 = arith.constant 0 : index
    %c0_68 = arith.constant 0 : index
    %149 = vector.load %arg9[%c0_67, %c0_68] : memref<1x64xf32, #tpu.memory_space<vmem>>, vector<1x64xf32>
    %150 = arith.mulf %138, %148 : vector<1x64xf32>
    %151 = arith.subf %149, %150 : vector<1x64xf32>
    %152 = vector.broadcast %148 : vector<1x64xf32> to vector<32x64xf32>
    %153 = arith.mulf %121, %152 : vector<32x64xf32>
    %154 = vector.broadcast %151 : vector<1x64xf32> to vector<32x64xf32>
    %155 = arith.addf %153, %154 : vector<32x64xf32>
    %cst_69 = arith.constant 0.000000e+00 : f32
    %156 = vector.broadcast %cst_69 : f32 to vector<32x64xf32>
    %157 = arith.maximumf %155, %156 : vector<32x64xf32>
    %c1_i32_70 = arith.constant 1 : i32
    %158 = tpu.dynamic_rotate %157 by %c1_i32_70 dim 0 : vector<32x64xf32>, i32 -> vector<32x64xf32>
    %cst_71 = arith.constant 0.000000e+00 : f32
    %159 = vector.shape_cast %4 : vector<32x1xi1> to vector<32x1xi1>
    %160 = vector.broadcast %159 : vector<32x1xi1> to vector<32x64xi1>
    %161 = vector.broadcast %cst_71 : f32 to vector<32x64xf32>
    %162 = arith.select %160, %161, %158 : vector<32x64xi1>, vector<32x64xf32>
    %c31_i32_72 = arith.constant 31 : i32
    %163 = tpu.dynamic_rotate %157 by %c31_i32_72 dim 0 : vector<32x64xf32>, i32 -> vector<32x64xf32>
    %cst_73 = arith.constant 0.000000e+00 : f32
    %164 = vector.shape_cast %6 : vector<32x1xi1> to vector<32x1xi1>
    %165 = vector.broadcast %164 : vector<32x1xi1> to vector<32x64xi1>
    %166 = vector.broadcast %cst_73 : f32 to vector<32x64xf32>
    %167 = arith.select %165, %166, %163 : vector<32x64xi1>, vector<32x64xf32>
    %c0_74 = arith.constant 0 : index
    %c0_75 = arith.constant 0 : index
    %c0_76 = arith.constant 0 : index
    %168 = vector.load %arg10[%c0_74, %c0_75, %c0_76] : memref<3x64x64xf32, #tpu.memory_space<vmem>>, vector<1x64x64xf32>
    %169 = vector.shape_cast %168 : vector<1x64x64xf32> to vector<64x64xf32>
    %cst_77 = arith.constant dense<0.000000e+00> : vector<32x64xf32>
    %170 = tpu.matmul %162, %169, %cst_77 {dimension_numbers = #tpu.dot_dimension_numbers<[1], [0], [0], [1], [0, 0, 1, 1], [], []>} : vector<32x64xf32>, vector<64x64xf32>, vector<32x64xf32> -> vector<32x64xf32>
    %c1_78 = arith.constant 1 : index
    %c0_79 = arith.constant 0 : index
    %c0_80 = arith.constant 0 : index
    %171 = vector.load %arg10[%c1_78, %c0_79, %c0_80] : memref<3x64x64xf32, #tpu.memory_space<vmem>>, vector<1x64x64xf32>
    %172 = vector.shape_cast %171 : vector<1x64x64xf32> to vector<64x64xf32>
    %cst_81 = arith.constant dense<0.000000e+00> : vector<32x64xf32>
    %173 = tpu.matmul %157, %172, %cst_81 {dimension_numbers = #tpu.dot_dimension_numbers<[1], [0], [0], [1], [0, 0, 1, 1], [], []>} : vector<32x64xf32>, vector<64x64xf32>, vector<32x64xf32> -> vector<32x64xf32>
    %174 = arith.addf %170, %173 : vector<32x64xf32>
    %c2_82 = arith.constant 2 : index
    %c0_83 = arith.constant 0 : index
    %c0_84 = arith.constant 0 : index
    %175 = vector.load %arg10[%c2_82, %c0_83, %c0_84] : memref<3x64x64xf32, #tpu.memory_space<vmem>>, vector<1x64x64xf32>
    %176 = vector.shape_cast %175 : vector<1x64x64xf32> to vector<64x64xf32>
    %cst_85 = arith.constant dense<0.000000e+00> : vector<32x64xf32>
    %177 = tpu.matmul %167, %176, %cst_85 {dimension_numbers = #tpu.dot_dimension_numbers<[1], [0], [0], [1], [0, 0, 1, 1], [], []>} : vector<32x64xf32>, vector<64x64xf32>, vector<32x64xf32> -> vector<32x64xf32>
    %178 = arith.addf %174, %177 : vector<32x64xf32>
    %c0_86 = arith.constant 0 : index
    %c0_87 = arith.constant 0 : index
    %179 = vector.load %arg11[%c0_86, %c0_87] : memref<1x128xf32, #tpu.memory_space<vmem>>, vector<1x128xf32>
    %cst_88 = arith.constant 9.99999974E-6 : f32
    %180 = vector.broadcast %cst_88 : f32 to vector<1x128xf32>
    %181 = arith.addf %29, %180 : vector<1x128xf32>
    %182 = math.rsqrt %181 : vector<1x128xf32>
    %183 = arith.mulf %179, %182 : vector<1x128xf32>
    %c0_89 = arith.constant 0 : index
    %c0_90 = arith.constant 0 : index
    %184 = vector.load %arg12[%c0_89, %c0_90] : memref<1x128xf32, #tpu.memory_space<vmem>>, vector<1x128xf32>
    %185 = arith.mulf %24, %183 : vector<1x128xf32>
    %186 = arith.subf %184, %185 : vector<1x128xf32>
    %187 = vector.broadcast %183 : vector<1x128xf32> to vector<32x128xf32>
    %188 = arith.mulf %7, %187 : vector<32x128xf32>
    %189 = vector.broadcast %186 : vector<1x128xf32> to vector<32x128xf32>
    %190 = arith.addf %188, %189 : vector<32x128xf32>
    %cst_91 = arith.constant 0.000000e+00 : f32
    %191 = vector.broadcast %cst_91 : f32 to vector<32x128xf32>
    %192 = arith.maximumf %190, %191 : vector<32x128xf32>
    %c0_92 = arith.constant 0 : index
    %c0_93 = arith.constant 0 : index
    %193 = vector.load %arg13[%c0_92, %c0_93] : memref<128x256xf32, #tpu.memory_space<vmem>>, vector<128x256xf32>
    %cst_94 = arith.constant dense<0.000000e+00> : vector<32x256xf32>
    %194 = tpu.matmul %192, %193, %cst_94 {dimension_numbers = #tpu.dot_dimension_numbers<[1], [0], [0], [1], [0, 0, 1, 1], [], []>} : vector<32x128xf32>, vector<128x256xf32>, vector<32x256xf32> -> vector<32x256xf32>
    %195 = tpu.concatenate %64, %121, %178 in 1 : vector<32x128xf32>, vector<32x64xf32>, vector<32x64xf32> -> vector<32x256xf32>
    %196 = arith.addf %195, %194 : vector<32x256xf32>
    %c0_95 = arith.constant 0 : index
    %c0_96 = arith.constant 0 : index
    %197 = vector.load %arg14[%c0_95, %c0_96] : memref<32x256xf32, #tpu.memory_space<vmem>>, vector<32x256xf32>
    tpu.vector_store %arg14[%c0_95, %c0_96], %196 {strides = array<i32>} : memref<32x256xf32, #tpu.memory_space<vmem>>, vector<32x256xf32>,
    return
  }
  func.func @transform_0(%arg0: i32) -> (i32, i32) {
    %c0_i32 = arith.constant 0 : i32
    %c0_i32_0 = arith.constant 0 : i32
    %c0_i32_1 = arith.constant 0 : i32
    return %c0_i32, %c0_i32_0 : i32, i32
  }
  func.func @transform_1(%arg0: i32) -> (i32, i32) {
    %c0_i32 = arith.constant 0 : i32
    %c0_i32_0 = arith.constant 0 : i32
    %c0_i32_1 = arith.constant 0 : i32
    return %c0_i32, %c0_i32_0 : i32, i32
  }
  func.func @transform_2(%arg0: i32) -> (i32, i32) {
    %c0_i32 = arith.constant 0 : i32
    %c0_i32_0 = arith.constant 0 : i32
    %c0_i32_1 = arith.constant 0 : i32
    return %c0_i32, %c0_i32_0 : i32, i32
  }
  func.func @transform_3(%arg0: i32) -> (i32, i32, i32) {
    %c0_i32 = arith.constant 0 : i32
    %c0_i32_0 = arith.constant 0 : i32
    %c0_i32_1 = arith.constant 0 : i32
    %c0_i32_2 = arith.constant 0 : i32
    return %c0_i32, %c0_i32_0, %c0_i32_1 : i32, i32, i32
  }
  func.func @transform_4(%arg0: i32) -> (i32, i32) {
    %c0_i32 = arith.constant 0 : i32
    %c0_i32_0 = arith.constant 0 : i32
    %c0_i32_1 = arith.constant 0 : i32
    return %c0_i32, %c0_i32_0 : i32, i32
  }
  func.func @transform_5(%arg0: i32) -> (i32, i32) {
    %c0_i32 = arith.constant 0 : i32
    %c0_i32_0 = arith.constant 0 : i32
    %c0_i32_1 = arith.constant 0 : i32
    return %c0_i32, %c0_i32_0 : i32, i32
  }
  func.func @transform_6(%arg0: i32) -> (i32, i32, i32) {
    %c0_i32 = arith.constant 0 : i32
    %c0_i32_0 = arith.constant 0 : i32
    %c0_i32_1 = arith.constant 0 : i32
    %c0_i32_2 = arith.constant 0 : i32
    return %c0_i32, %c0_i32_0, %c0_i32_1 : i32, i32, i32
  }
  func.func @transform_7(%arg0: i32) -> (i32, i32) {
    %c0_i32 = arith.constant 0 : i32
    %c0_i32_0 = arith.constant 0 : i32
    %c0_i32_1 = arith.constant 0 : i32
    return %c0_i32, %c0_i32_0 : i32, i32
  }
  func.func @transform_8(%arg0: i32) -> (i32, i32) {
    %c0_i32 = arith.constant 0 : i32
    %c0_i32_0 = arith.constant 0 : i32
    %c0_i32_1 = arith.constant 0 : i32
    return %c0_i32, %c0_i32_0 : i32, i32
  }
  func.func @transform_9(%arg0: i32) -> (i32, i32, i32) {
    %c0_i32 = arith.constant 0 : i32
    %c0_i32_0 = arith.constant 0 : i32
    %c0_i32_1 = arith.constant 0 : i32
    %c0_i32_2 = arith.constant 0 : i32
    return %c0_i32, %c0_i32_0, %c0_i32_1 : i32, i32, i32
  }
  func.func @transform_10(%arg0: i32) -> (i32, i32) {
    %c0_i32 = arith.constant 0 : i32
    %c0_i32_0 = arith.constant 0 : i32
    %c0_i32_1 = arith.constant 0 : i32
    return %c0_i32, %c0_i32_0 : i32, i32
  }
  func.func @transform_11(%arg0: i32) -> (i32, i32) {
    %c0_i32 = arith.constant 0 : i32
    %c0_i32_0 = arith.constant 0 : i32
    %c0_i32_1 = arith.constant 0 : i32
    return %c0_i32, %c0_i32_0 : i32, i32
  }
  func.func @transform_12(%arg0: i32) -> (i32, i32) {
    %c0_i32 = arith.constant 0 : i32
    %c0_i32_0 = arith.constant 0 : i32
    %c0_i32_1 = arith.constant 0 : i32
    return %c0_i32, %c0_i32_0 : i32, i32
  }
  func.func @transform_13(%arg0: i32) -> (i32, i32) {
    %c0_i32 = arith.constant 0 : i32
    %c0_i32_0 = arith.constant 0 : i32
    %c0_i32_1 = arith.constant 0 : i32
    return %c0_i32, %c0_i32_0 : i32, i32
  }
}

</mosaic_0001>

<bundles_post_ra>
// kernel: tpu_custom_call.1
= control target key start
LH: loop header
LB: loop body
LE: loop exit
PB: predicated region body
PF: predicated region fallthrough
CT: control target
= control target key end

     0   :  { %18 = vsyncpa [#allocation3], 0  ;;  %s2652_s0 = inlined_call_operand.hbm [shape: f32[32,128], index: 0, kind: input, shape index: {}]   ;;  %s2653_s1 = inlined_call_operand.vmem [shape: f32[1,128], index: 1, kind: input, shape index: {}]   ;;  %s2654_s2 = inlined_call_operand.vmem [shape: f32[1,128], index: 2, kind: input, shape index: {}]   ;;  %s2655_s3 = inlined_call_operand.vmem [shape: f32[3,128,128], index: 3, kind: input, shape index: {}]   ;;  %s2656_s4 = inlined_call_operand.hbm [shape: f32[1,128], index: 4, kind: input, shape index: {}]   ;;  %s2657_s5 = inlined_call_operand.hbm [shape: f32[1,128], index: 5, kind: input, shape index: {}]   ;;  %s2658_s6 = inlined_call_operand.vmem [shape: f32[3,128,64], index: 6, kind: input, shape index: {}]   ;;  %s2659_s7 = inlined_call_operand.vmem [shape: f32[1,64], index: 7, kind: input, shape index: {}]   ;;  %s2660_s8 = inlined_call_operand.vmem [shape: f32[1,64], index: 8, kind: input, shape index: {}]   ;;  %s2661_s9 = inlined_call_operand.vmem [shape: f32[3,64,64], index: 9, kind: input, shape index: {}]   ;;  %s2662_s10 = inlined_call_operand.vmem [shape: f32[1,128], index: 10, kind: input, shape index: {}]   ;;  %s2663_s11 = inlined_call_operand.vmem [shape: f32[1,128], index: 11, kind: input, shape index: {}]   ;;  %s2664_s12 = inlined_call_operand.hbm [shape: f32[128,256], index: 12, kind: input, shape index: {}]   ;;  %s2665_s13 = inlined_call_operand.hbm [shape: f32[32,256], index: 13, kind: output, shape index: {}]  }
   0x1   :  { %19 = vsyncpa [#allocation6], 0 }
   0x2   :  { %20 = vsyncpa [#allocation9], 0  ;;  %s46_s27 = sshll.u32 %s2656_s4, 4  ;;  %s47_s27 = int_to_ptr.hbm [resolvable:$true] %s46_s27 }
   0x3   :  { %21 = vsyncpa [#allocation4], 0  ;;  %s1565_s28 = smov [#allocation5]   ;;  %s26_s15 = sshll.u32 %s2652_s0, 4  ;;  %s27_s15 = int_to_ptr.hbm [resolvable:$true] %s26_s15 }
   0x4   :  { %s48_s29 = sshll.u32 %s1565_s28, 4  ;;  %s1566_s16 = smov [#allocation2]   ;;  %s49_s29 = int_to_ptr.vmem [resolvable:$true] %s48_s29 }
   0x5   :  { %51 = dma.hbm_to_vmem [thread:$0]  %s47_s27, 16, %s49_s29, [#allocation6]  }
   0x6   :  { %s28_s17 = sshll.u32 %s1566_s16, 4  ;;  %s1567_s18 = smov 128   ;;  %s29_s17 = int_to_ptr.vmem [resolvable:$true] %s28_s17 }
   0x7   :  { %s1568_s19 = smov 8   ;;  %s57_s4 = sshll.u32 %s2657_s5, 4  ;;  %s58_s4 = int_to_ptr.hbm [resolvable:$true] %s57_s4 }
   0x8   :  { %34 = dma.hbm_to_vmem [thread:$0]  %s27_s15, 512, %s29_s17, [#allocation3], %s1567_s18, %s1567_s18, %s1568_s19  }
   0x9   :  { %s1569_s22 = smov [#allocation7]   ;;  %s79_s0 = sshll.u32 %s2664_s12, 4  ;;  %s80_s0 = int_to_ptr.hbm [resolvable:$true] %s79_s0 }
   0xa   :  { %s59_s23 = sshll.u32 %s1569_s22, 4  ;;  %s1570_s26 = smov [#allocation8]   ;;  %s60_s23 = int_to_ptr.vmem [resolvable:$true] %s59_s23 }
   0xb   :  { %62 = dma.hbm_to_vmem [thread:$0]  %s58_s4, 16, %s60_s23, [#allocation6]  }
   0xc   :  { %s81_s27 = sshll.u32 %s1570_s26, 4  ;;  %s1571_s28 = smov 256   ;;  %s82_s27 = int_to_ptr.vmem [resolvable:$true] %s81_s27 }
   0xd   :  { %s1572_s29 = smov 16  }
   0xe   :  { %87 = dma.hbm_to_vmem [thread:$0]  %s80_s0, 4096, %s82_s27, [#allocation9], %s1571_s28, %s1571_s28, %s1572_s29  }
   0xf   :  { %1557 = dma.done.wait [#allocation3], 512  }
  0x10   :  { %1558 = vsyncadd [#allocation3], 4294966784 }
  0x11   :  { %1559 = dma.done.wait [#allocation6], 32  }
  0x12   :  { %1560 = vsyncadd [#allocation6], 4294967264  ;;  %v104_v0 = vlaneseq }
  0x13   :  { %1561 = dma.done.wait [#allocation9], 4096  }
  0x14   :  { %1562 = vsyncadd [#allocation9], 4294963200  ;;  %v1661_v1 = vshrl.u32 %v104_v0, 7  ;;  %v138_v2 = vand.u32 127, %v104_v0  ;;  %v1573_v16 = vmov 1.0   ;;  %v1711_v24 = vld [vmem:[#allocation2] sm:$0xff] }
  0x15   :  { %v1713_v25 = vld [vmem:[#allocation2 + $0x8] sm:$0xff]  ;;  %v1721_v28 = vld [vmem:[#allocation2 + $0x10] sm:$0xff]  ;;  %v1734_v31 = vld [vmem:[#allocation2 + $0x18] sm:$0xff]  ;;  %v213_v34 = vmul.f32 %v1711_v24, %v1711_v24  ;;  %s1199_s18 = sshll.u32 %s2665_s13, 4  ;;  %s1200_s18 = int_to_ptr.hbm [resolvable:$true] %s1199_s18 }
  0x16   :  { %v136_v3 = vadd.s32 120, %v1661_v1  ;;  %v1664_v4 = vshra.s32 %v138_v2, 4  ;;  %v135_v5 = vadd.s32 112, %v1661_v1  ;;  %v134_v6 = vadd.s32 104, %v1661_v1  ;;  %v270_v22 = vld [vmem:[%s2653_s1] sm:$0x1] }
  0x17   :  { %v133_v7 = vadd.s32 96, %v1661_v1  ;;  %v132_v11 = vadd.s32 88, %v1661_v1  ;;  %v131_v12 = vadd.s32 80, %v1661_v1  ;;  %v130_v17 = vadd.s32 72, %v1661_v1  ;;  %v1044_v29 = vld [vmem:[%s2662_s10] sm:$0x1] }
  0x18   :  { %v154_v8 = vshra.s32 %v136_v3, 4  ;;  %v153_v9 = vshra.s32 %v135_v5, 4  ;;  %v152_v10 = vshra.s32 %v134_v6, 4  ;;  %v129_v21 = vadd.s32 64, %v1661_v1  ;;  %v1349_v49 = vld [vmem:[%s2658_s6 + $0xf8] sm:$0xff]  ;;  %v1348_v54 = vld [vmem:[%s2658_s6 + $0xf0] sm:$0xff] }
  0x19   :  { %v151_v15 = vshra.s32 %v133_v7, 4  ;;  %v150_v19 = vshra.s32 %v132_v11, 4  ;;  %v149_v20 = vshra.s32 %v131_v12, 4  ;;  %v148_v23 = vshra.s32 %v130_v17, 4  ;;  %v626_v59 = vld [vmem:[%s2658_s6 + $0x78] sm:$0xff]  ;;  %v625_v5 = vld [vmem:[%s2658_s6 + $0x70] sm:$0xff] }
  0x1a   :  { %vm1672_vm0 = vcmp.eq.s32.totalorder %v154_v8, %v1664_v4  ;;  %vm1677_vm1 = vcmp.eq.s32.totalorder %v153_v9, %v1664_v4  ;;  %vm1689_vm2 = vcmp.eq.s32.totalorder %v152_v10, %v1664_v4  ;;  %v128_v27 = vadd.s32 56, %v1661_v1  ;;  %v1369_v63 = vld [vmem:[%s2658_s6 + $0x178] sm:$0xff]  ;;  %v1368_v8 = vld [vmem:[%s2658_s6 + $0x170] sm:$0xff]  ;;  %v1346_v12 = vld [vmem:[%s2658_s6 + $0xe0] sm:$0xff] }
  0x1b   :  { %1230 = vmatpush.msk.msra.mxu0 %vm1672_vm0, %v1573_v16  ;;  %1246 = vmatpush.msk.msra.mxu1 %vm1672_vm0, %v1573_v16  ;;  %vm1701_vm3 = vcmp.eq.s32.totalorder %v151_v15, %v1664_v4  ;;  %vm1716_vm4 = vcmp.eq.s32.totalorder %v150_v19, %v1664_v4  ;;  %vm1730_vm5 = vcmp.eq.s32.totalorder %v149_v20, %v1664_v4  ;;  %v147_v30 = vshra.s32 %v129_v21, 4  ;;  %v1276_v20 = vld [vmem:[%s2655_s3 + $0xf0] sm:$0xff]  ;;  %v361_v21 = vld [vmem:[%s2655_s3 + $0x78] sm:$0xff]  ;;  %v624_v15 = vld [vmem:[%s2658_s6 + $0x68] sm:$0xff] }
  0x1c   :  { %v127_v32 = vadd.s32 48, %v1661_v1  ;;  %v204_v33 = vadd.f32 %v1713_v25, %v1711_v24  ;;  %v214_v35 = vmul.f32 %v1713_v25, %v1713_v25  ;;  %vm1750_vm6 = vcmp.eq.s32.totalorder %v148_v23, %v1664_v4  ;;  %v1297_v23 = vld [vmem:[%s2655_s3 + $0x178] sm:$0xff]  ;;  %408 = vmatpush.msra.mxu3 %v361_v21 }
  0x1d   :  { %1231 = vmatpush.msk.msra.mxu0 %vm1677_vm1, %v1573_v16  ;;  %1247 = vmatpush.msk.msra.mxu1 %vm1677_vm1, %v1573_v16  ;;  %v126_v37 = vadd.s32 40, %v1661_v1  ;;  %v215_v38 = vmul.f32 %v1721_v28, %v1721_v28  ;;  %v146_v39 = vshra.s32 %v128_v27, 4  ;;  %v216_v41 = vmul.f32 %v1734_v31, %v1734_v31  ;;  %v1275_v27 = vld [vmem:[%s2655_s3 + $0xe8] sm:$0xff]  ;;  %v1285_v21 = vld [vmem:[%s2655_s3 + $0x118] sm:$0xff] }
  0x1e   :  { %v205_v40 = vadd.f32 %v204_v33, %v1721_v28  ;;  %v217_v42 = vadd.f32 %v214_v35, %v213_v34  ;;  %vm1767_vm7 = vcmp.eq.s32.totalorder %v147_v30, %v1664_v4  ;;  %v145_v44 = vshra.s32 %v127_v32, 4  ;;  %v360_v30 = vld [vmem:[%s2655_s3 + $0x70] sm:$0xff]  ;;  %v1274_v33 = vld [vmem:[%s2655_s3 + $0xe0] sm:$0xff]  ;;  %v359_v34 = vld [vmem:[%s2655_s3 + $0x68] sm:$0xff] }
  0x1f   :  { %1232 = vmatpush.msk.msra.mxu0 %vm1689_vm2, %v1573_v16  ;;  %1248 = vmatpush.msk.msra.mxu1 %vm1689_vm2, %v1573_v16  ;;  %v125_v45 = vadd.s32 32, %v1661_v1  ;;  %v1780_v48 = vadd.s32 24, %v1661_v1  ;;  %vm1783_vm8 = vcmp.eq.s32.totalorder %v146_v39, %v1664_v4  ;;  %v144_v50 = vshra.s32 %v126_v37, 4  ;;  %v1296_v32 = vld [vmem:[%s2655_s3 + $0x170] sm:$0xff]  ;;  %v1295_v35 = vld [vmem:[%s2655_s3 + $0x168] sm:$0xff]  ;;  %v1273_v37 = vld [vmem:[%s2655_s3 + $0xd8] sm:$0xff] }
  0x20   :  { %v206_v46 = vadd.f32 %v205_v40, %v1734_v31  ;;  %v218_v47 = vadd.f32 %v217_v42, %v215_v38  ;;  %v1794_v53 = vadd.s32 16, %v1661_v1  ;;  %vm1797_vm9 = vcmp.eq.s32.totalorder %v145_v44, %v1664_v4  ;;  %409 = vmatpush.msra.mxu3 %v360_v30  ;;  %v358_v38 = vld [vmem:[%s2655_s3 + $0x60] sm:$0xff]  ;;  %v1272_v40 = vld [vmem:[%s2655_s3 + $0xd0] sm:$0xff]  ;;  %v1293_v42 = vld [vmem:[%s2655_s3 + $0x158] sm:$0xff] }
  0x21   :  { %1233 = vmatpush.msk.msra.mxu0 %vm1701_vm3, %v1573_v16  ;;  %1249 = vmatpush.msk.msra.mxu1 %vm1701_vm3, %v1573_v16  ;;  %v143_v55 = vshra.s32 %v125_v45, 4  ;;  %v1808_v58 = vadd.s32 8, %v1661_v1  ;;  %vm1811_vm10 = vcmp.eq.s32.totalorder %v144_v50, %v1664_v4  ;;  %v142_v60 = vshra.s32 %v1780_v48, 4  ;;  %v1294_v39 = vld [vmem:[%s2655_s3 + $0x160] sm:$0xff]  ;;  %v1271_v44 = vld [vmem:[%s2655_s3 + $0xc8] sm:$0xff]  ;;  %v356_v45 = vld [vmem:[%s2655_s3 + $0x50] sm:$0xff] }
  0x22   :  { %v207_v51 = vrot.slane %v206_v46, 4  ;;  %v219_v52 = vadd.f32 %v218_v47, %v216_v41  ;;  %v141_v0 = vshra.s32 %v1794_v53, 4  ;;  %v139_v9 = vshra.s32 %v1661_v1, 4  ;;  %410 = vmatpush.msra.mxu3 %v359_v34  ;;  %v357_v41 = vld [vmem:[%s2655_s3 + $0x58] sm:$0xff]  ;;  %v1270_v47 = vld [vmem:[%s2655_s3 + $0xc0] sm:$0xff]  ;;  %v355_v50 = vld [vmem:[%s2655_s3 + $0x48] sm:$0xff] }
  0x23   :  { %1234 = vmatpush.msk.msra.mxu0 %vm1716_vm4, %v1573_v16  ;;  %1250 = vmatpush.msk.msra.mxu1 %vm1716_vm4, %v1573_v16  ;;  %vm1823_vm11 = vcmp.eq.s32.totalorder %v143_v55, %v1664_v4  ;;  %vm1835_vm12 = vcmp.eq.s32.totalorder %v142_v60, %v1664_v4  ;;  %v140_v6 = vshra.s32 %v1808_v58, 4  ;;  %v354_v55 = vld [vmem:[%s2655_s3 + $0x40] sm:$0xff]  ;;  %v353_v60 = vld [vmem:[%s2655_s3 + $0x38] sm:$0xff]  ;;  %v1263_v30 = vld [vmem:[%s2655_s3 + $0x88] sm:$0xff] }
  0x24   :  { %v208_v56 = vadd.f32 %v207_v51, %v206_v46  ;;  %v220_v57 = vrot.slane %v219_v52, 4  ;;  %vm1847_vm13 = vcmp.eq.s32.totalorder %v141_v0, %v1664_v4  ;;  %vm1870_vm15 = vcmp.eq.s32.totalorder %v139_v9, %v1664_v4  ;;  %411 = vmatpush.msra.mxu3 %v358_v38  ;;  %v1292_v46 = vld [vmem:[%s2655_s3 + $0x150] sm:$0xff]  ;;  %v1291_v51 = vld [vmem:[%s2655_s3 + $0x148] sm:$0xff]  ;;  %v1265_v9 = vld [vmem:[%s2655_s3 + $0x98] sm:$0xff] }
  0x25   :  { %1235 = vmatpush.msk.msra.mxu0 %vm1730_vm5, %v1573_v16  ;;  %1251 = vmatpush.msk.msra.mxu1 %vm1730_vm5, %v1573_v16  ;;  %vm1859_vm14 = vcmp.eq.s32.totalorder %v140_v6, %v1664_v4  ;;  %v1277_v4 = vld [vmem:[%s2655_s3 + $0xf8] sm:$0xff]  ;;  %v352_v0 = vld [vmem:[%s2655_s3 + $0x30] sm:$0xff]  ;;  %v351_v6 = vld [vmem:[%s2655_s3 + $0x28] sm:$0xff] }
  0x26   :  { %v209_v61 = vrot.slane %v208_v56, 2  ;;  %v221_v62 = vadd.f32 %v220_v57, %v219_v52  ;;  %379 = vmatpush.msra.mxu2 %v1277_v4  ;;  %412 = vmatpush.msra.mxu3 %v357_v41  ;;  %v1269_v52 = vld [vmem:[%s2655_s3 + $0xb8] sm:$0xff]  ;;  %v1268_v57 = vld [vmem:[%s2655_s3 + $0xb0] sm:$0xff]  ;;  %v347_v38 = vld [vmem:[%s2655_s3 + $0x8] sm:$0xff] }
  0x27   :  { %1236 = vmatpush.msk.msra.mxu0 %vm1750_vm6, %v1573_v16  ;;  %1252 = vmatpush.msk.msra.mxu1 %vm1750_vm6, %v1573_v16  ;;  %v1264_v4 = vld [vmem:[%s2655_s3 + $0x90] sm:$0xff]  ;;  %v346_v41 = vld [vmem:[%s2655_s3] sm:$0xff] }
  0x28   :  { %v210_v2 = vadd.f32 %v209_v61, %v208_v56  ;;  %v222_v3 = vrot.slane %v221_v62, 2  ;;  %380 = vmatpush.msra.mxu2 %v1276_v20  ;;  %413 = vmatpush.msra.mxu3 %v356_v45  ;;  %v1290_v56 = vld [vmem:[%s2655_s3 + $0x140] sm:$0xff]  ;;  %v1289_v61 = vld [vmem:[%s2655_s3 + $0x138] sm:$0xff] }
  0x29   :  { %1237 = vmatpush.msk.msra.mxu0 %vm1767_vm7, %v1573_v16  ;;  %1253 = vmatpush.msk.msra.mxu1 %vm1767_vm7, %v1573_v16  ;;  %v349_v20 = vld [vmem:[%s2655_s3 + $0x18] sm:$0xff] }
  0x2a   :  { %v223_v7 = vadd.f32 %v222_v3, %v221_v62  ;;  %v211_v10 = vrot.slane %v210_v2, 1  ;;  %381 = vmatpush.msra.mxu2 %v1275_v27  ;;  %414 = vmatpush.msra.mxu3 %v355_v50  ;;  %v1267_v62 = vld [vmem:[%s2655_s3 + $0xa8] sm:$0xff]  ;;  %v1266_v3 = vld [vmem:[%s2655_s3 + $0xa0] sm:$0xff] }
  0x2b   :  { %1238 = vmatpush.msk.msra.mxu0 %vm1783_vm8, %v1573_v16  ;;  %1254 = vmatpush.msk.msra.mxu1 %vm1783_vm8, %v1573_v16  ;;  %v283_v50 = vld [vmem:[%s2654_s2] sm:$0x1] }
  0x2c   :  { %v224_v11 = vrot.slane %v223_v7, 1  ;;  %v212_v17 = vadd.f32 %v211_v10, %v210_v2  ;;  %382 = vmatpush.msra.mxu2 %v1274_v33  ;;  %415 = vmatpush.msra.mxu3 %v354_v55  ;;  %v1288_v2 = vld [vmem:[%s2655_s3 + $0x130] sm:$0xff]  ;;  %v350_v10 = vld [vmem:[%s2655_s3 + $0x20] sm:$0xff] }
  0x2d   :  { %1239 = vmatpush.msk.msra.mxu0 %vm1797_vm9, %v1573_v16  ;;  %1255 = vmatpush.msk.msra.mxu1 %vm1797_vm9, %v1573_v16  ;;  %v1284_v33 = vld [vmem:[%s2655_s3 + $0x110] sm:$0xff] }
  0x2e   :  { %v225_v19 = vadd.f32 %v224_v11, %v223_v7  ;;  %383 = vmatpush.msra.mxu2 %v1273_v37  ;;  %416 = vmatpush.msra.mxu3 %v353_v60  ;;  %v1287_v7 = vld [vmem:[%s2655_s3 + $0x128] sm:$0xff]  ;;  %v1286_v11 = vld [vmem:[%s2655_s3 + $0x120] sm:$0xff] }
  0x2f   :  { %1240 = vmatpush.msk.msra.mxu0 %vm1811_vm10, %v1573_v16  ;;  %1256 = vmatpush.msk.msra.mxu1 %vm1811_vm10, %v1573_v16 }
  0x30   :  { %384 = vmatpush.msra.mxu2 %v1272_v40  ;;  %417 = vmatpush.msra.mxu3 %v352_v0 }
  0x31   :  { %1241 = vmatpush.msk.msra.mxu0 %vm1823_vm11, %v1573_v16  ;;  %1257 = vmatpush.msk.msra.mxu1 %vm1823_vm11, %v1573_v16 }
  0x32   :  { %385 = vmatpush.msra.mxu2 %v1271_v44  ;;  %418 = vmatpush.msra.mxu3 %v351_v6 }
  0x33   :  { %1242 = vmatpush.msk.msra.mxu0 %vm1835_vm12, %v1573_v16  ;;  %1258 = vmatpush.msk.msra.mxu1 %vm1835_vm12, %v1573_v16 }
  0x34   :  { %386 = vmatpush.msra.mxu2 %v1270_v47  ;;  %419 = vmatpush.msra.mxu3 %v350_v10  ;;  %v1046_v47 = vld [vmem:[%s2663_s11] sm:$0x1] }
  0x35   :  { %1243 = vmatpush.msk.msra.mxu0 %vm1847_vm13, %v1573_v16  ;;  %1259 = vmatpush.msk.msra.mxu1 %vm1847_vm13, %v1573_v16 }
  0x36   :  { %387 = vmatpush.msra.mxu2 %v1269_v52  ;;  %420 = vmatpush.msra.mxu3 %v349_v20 }
  0x37   :  { %1244 = vmatpush.msk.msra.mxu0 %vm1859_vm14, %v1573_v16  ;;  %1260 = vmatpush.msk.msra.mxu1 %vm1859_vm14, %v1573_v16 }
  0x38   :  { %388 = vmatpush.msra.mxu2 %v1268_v57 }
  0x39   :  { %1245 = vmatpush.msk.msra.mxu0 %vm1870_vm15, %v1573_v16  ;;  %1261 = vmatpush.msk.msra.mxu1 %vm1870_vm15, %v1573_v16 }
  0x3a   :  { %242 = vmatmul.f32.vlgmr.msra.gmra.mxu0 %v212_v17  ;;  %263 = vmatmul.f32.vlgmr.msra.gmra.mxu1 %v225_v19 }
  0x3b   :  { %1302 = vmatpush.msk.msrb.mxu1 %vm1672_vm0, %v1573_v16  ;;  %454 = vmatpush.msrb.mxu0 %v1297_v23 }
  0x3c   :  { %389 = vmatpush.msra.mxu2 %v1267_v62 }
  0x3d   :  { %1303 = vmatpush.msk.msrb.mxu1 %vm1677_vm1, %v1573_v16  ;;  %455 = vmatpush.msrb.mxu0 %v1296_v32  ;;  %v348_v32 = vld [vmem:[%s2655_s3 + $0x10] sm:$0xff] }
  0x3e   :  { %390 = vmatpush.msra.mxu2 %v1266_v3  ;;  %421 = vmatpush.msra.mxu3 %v348_v32 }
  0x3f   :  { %1304 = vmatpush.msk.msrb.mxu1 %vm1689_vm2, %v1573_v16  ;;  %456 = vmatpush.msrb.mxu0 %v1295_v35  ;;  %v1262_v35 = vld [vmem:[%s2655_s3 + $0x80] sm:$0xff] }
  0x40   :  { %391 = vmatpush.msra.mxu2 %v1265_v9  ;;  %422 = vmatpush.msra.mxu3 %v347_v38  ;;  %v110_v38 = vand.u32 15, %v1808_v58 }
  0x41   :  { %1305 = vmatpush.msk.msrb.mxu1 %vm1701_vm3, %v1573_v16  ;;  %457 = vmatpush.msrb.mxu0 %v1294_v39  ;;  %v1283_v39 = vld [vmem:[%s2655_s3 + $0x108] sm:$0xff] }
  0x42   :  { %392 = vmatpush.msra.mxu2 %v1264_v4  ;;  %423 = vmatpush.msra.mxu3 %v346_v41 }
  0x43   :  { %1306 = vmatpush.msk.msrb.mxu1 %vm1716_vm4, %v1573_v16  ;;  %458 = vmatpush.msrb.mxu0 %v1293_v42  ;;  %v1282_v42 = vld [vmem:[%s2655_s3 + $0x100] sm:$0xff] }
  0x44   :  { %393 = vmatpush.msra.mxu2 %v1263_v30  ;;  %644 = vmatpush.msrb.mxu3 %v1349_v49  ;;  %v612_v49 = vld [vmem:[%s2658_s6 + $0x8] sm:$0xff] }
  0x45   :  { %1307 = vmatpush.msk.msrb.mxu1 %vm1730_vm5, %v1573_v16  ;;  %459 = vmatpush.msrb.mxu0 %v1292_v46 }
  0x46   :  { %394 = vmatpush.msra.mxu2 %v1262_v35  ;;  %645 = vmatpush.msrb.mxu3 %v1348_v54  ;;  %v1355_v54 = vld [vmem:[%s2658_s6 + $0x108] sm:$0xff] }
  0x47   :  { %1308 = vmatpush.msk.msrb.mxu1 %vm1750_vm6, %v1573_v16  ;;  %460 = vmatpush.msrb.mxu0 %v1291_v51  ;;  %v109_v51 = vand.u32 15, %v1661_v1 }
  0x48   :  { %1318 = vmatpush.msk.msrb.mxu2 %vm1672_vm0, %v1573_v16 }
  0x49   :  { %1309 = vmatpush.msk.msrb.mxu1 %vm1767_vm7, %v1573_v16  ;;  %461 = vmatpush.msrb.mxu0 %v1290_v56 }
  0x4a   :  { %1319 = vmatpush.msk.msrb.mxu2 %vm1677_vm1, %v1573_v16 }
  0x4b   :  { %1310 = vmatpush.msk.msrb.mxu1 %vm1783_vm8, %v1573_v16  ;;  %462 = vmatpush.msrb.mxu0 %v1289_v61 }
  0x4c   :  { %1320 = vmatpush.msk.msrb.mxu2 %vm1689_vm2, %v1573_v16 }
  0x4d   :  { %1311 = vmatpush.msk.msrb.mxu1 %vm1797_vm9, %v1573_v16  ;;  %463 = vmatpush.msrb.mxu0 %v1288_v2 }
  0x4e   :  { %1321 = vmatpush.msk.msrb.mxu2 %vm1701_vm3, %v1573_v16  ;;  %vm2128_vm3 = vcmp.eq.s32.totalorder %v109_v51, 0 }
  0x4f   :  { %1312 = vmatpush.msk.msrb.mxu1 %vm1811_vm10, %v1573_v16  ;;  %464 = vmatpush.msrb.mxu0 %v1287_v7 }
  0x50   :  { %1322 = vmatpush.msk.msrb.mxu2 %vm1716_vm4, %v1573_v16  ;;  %vm308_vm4 = vcmp.lt.s32.totalorder %v1661_v1, 1 }
  0x51   :  { %1313 = vmatpush.msk.msrb.mxu1 %vm1823_vm11, %v1573_v16  ;;  %465 = vmatpush.msrb.mxu0 %v1286_v11 }
  0x52   :  { %1323 = vmatpush.msk.msrb.mxu2 %vm1730_vm5, %v1573_v16  ;;  %vm329_vm5 = vcmp.lt.s32.totalorder %v1661_v1, 7 }
  0x53   :  { %1314 = vmatpush.msk.msrb.mxu1 %vm1835_vm12, %v1573_v16  ;;  %466 = vmatpush.msrb.mxu0 %v1285_v21 }
  0x54   :  { %1324 = vmatpush.msk.msrb.mxu2 %vm1750_vm6, %v1573_v16  ;;  %vm2667_vm6 = vmneg %vm2128_vm3 }
  0x55   :  { %1315 = vmatpush.msk.msrb.mxu1 %vm1847_vm13, %v1573_v16  ;;  %467 = vmatpush.msrb.mxu0 %v1284_v33 }
  0x56   :  { %1325 = vmatpush.msk.msrb.mxu2 %vm1767_vm7, %v1573_v16  ;;  %vm2177_vm7 = vcmp.eq.s32.totalorder %v110_v38, 15 }
  0x57   :  { %1316 = vmatpush.msk.msrb.mxu1 %vm1859_vm14, %v1573_v16  ;;  %468 = vmatpush.msrb.mxu0 %v1283_v39 }
  0x58   :  { %1326 = vmatpush.msk.msrb.mxu2 %vm1783_vm8, %v1573_v16 }
  0x59   :  { %1317 = vmatpush.msk.msrb.mxu1 %vm1870_vm15, %v1573_v16  ;;  %469 = vmatpush.msrb.mxu0 %v1282_v42 }
  0x5a   :  { %1327 = vmatpush.msk.msrb.mxu2 %vm1797_vm9, %v1573_v16 }
  0x5b   :  { %673 = vmatpush.msra.mxu0 %v626_v59  ;;  %719 = vmatpush.msra.mxu1 %v1369_v63  ;;  %v611_v59 = vld [vmem:[%s2658_s6] sm:$0xff] }
  0x5c   :  { %1328 = vmatpush.msk.msrb.mxu2 %vm1811_vm10, %v1573_v16  ;;  %v1354_v63 = vld [vmem:[%s2658_s6 + $0x100] sm:$0xff] }
  0x5d   :  { %674 = vmatpush.msra.mxu0 %v625_v5  ;;  %720 = vmatpush.msra.mxu1 %v1368_v8  ;;  %v1095_v5 = vld [vmem:[#allocation8 + $0xe0] sm:$0xff] }
  0x5e   :  { %1329 = vmatpush.msk.msrb.mxu2 %vm1823_vm11, %v1573_v16 }
  0x5f   :  { %675 = vmatpush.msra.mxu0 %v624_v15  ;;  %v1091_v15 = vld [vmem:[#allocation8 + $0xc0] sm:$0xff] }
  0x60   :  { %1330 = vmatpush.msk.msrb.mxu2 %vm1835_vm12, %v1573_v16 }
  0x62   :  { %1331 = vmatpush.msk.msrb.mxu2 %vm1847_vm13, %v1573_v16 }
  0x64   :  { %1332 = vmatpush.msk.msrb.mxu2 %vm1859_vm14, %v1573_v16 }
  0x66   :  { %1333 = vmatpush.msk.msrb.mxu2 %vm1870_vm15, %v1573_v16 }
  0xb7   :  { %v243_v17 = vpop.f32.mrf.mxu0  ;;  %v264_v19 = vpop.f32.mrf.mxu1 }
  0xb8   :  { %v246_v23 = vmul.f32 0.001953125, %v243_v17  ;;  %v267_v27 = vmul.f32 0.001953125, %v264_v19 }
  0xba   :  { %v268_v34 = vmul.f32 %v246_v23, %v246_v23 }
  0xbc   :  { %v269_v37 = vsub.f32 %v267_v27, %v268_v34 }
  0xbe   :  { %v271_v40 = vadd.f32 1e-05, %v269_v37 }
  0xc0   :  { %1431 = vrsqrt.f32 %v271_v40  ;;  %vm278_vm1 = vweird.f32 %v271_v40 }
  0xc6   :  { %v1432_v44 = vpop.eup %1431 }
  0xc7   :  { %v273_v45 = vmul.f32 %v1432_v44, %v271_v40  ;;  %vm279_vm0 = vweird.f32 %v1432_v44 }
  0xc8   :  { %vm280_vm2 = vmor %vm278_vm1, %vm279_vm0 }
  0xc9   :  { %v274_v13 = vmul.f32 %v1432_v44, %v273_v45  ;;  %vm2666_vm0 = vmneg %vm2177_vm7  ;;  %v111_v45 = vand.u32 15, %v1794_v53 }
  0xcb   :  { %v275_v14 = vmul.f32 0.5, %v274_v13  ;;  %vm2200_vm1 = vcmp.eq.s32.totalorder %v111_v45, 0 }
  0xcd   :  { %v276_v18 = vsub.f32 1.5, %v275_v14 }
  0xcf   :  { %v277_v26 = vmul.f32 %v1432_v44, %v276_v18 }
  0xd1   :  { %v281_v36 = vsel %vm280_vm2, %v1432_v44, %v277_v26  ;;  %vm1280_vm2 = vmneg %vm2200_vm1  ;;  %v112_v26 = vand.u32 15, %v1780_v48 }
  0xd2   :  { %v282_v43 = vmul.f32 %v281_v36, %v270_v22  ;;  %v1045_v46 = vmul.f32 %v1044_v29, %v281_v36 }
  0xd4   :  { %v284_v52 = vmul.f32 %v282_v43, %v246_v23  ;;  %v287_v55 = vperm.slane %v282_v43, 0  ;;  %v1047_v56 = vmul.f32 %v1045_v46, %v246_v23  ;;  %v1050_v57 = vperm.slane %v1045_v46, 0 }
  0xd6   :  { %v1048_v60 = vsub.f32 %v1046_v47, %v1047_v56  ;;  %v285_v61 = vsub.f32 %v283_v50, %v284_v52  ;;  %v289_v62 = vmul.f32 %v287_v55, %v1711_v24  ;;  %v292_v3 = vmul.f32 %v287_v55, %v1734_v31 }
  0xd7   :  { %v290_v6 = vmul.f32 %v287_v55, %v1713_v25  ;;  %v1052_v9 = vmul.f32 %v1050_v57, %v1711_v24  ;;  %v1053_v10 = vmul.f32 %v1050_v57, %v1713_v25  ;;  %v1054_v11 = vmul.f32 %v1050_v57, %v1721_v28 }
  0xd8   :  { %v294_v2 = vperm.slane %v285_v61, 0  ;;  %v1057_v7 = vperm.slane %v1048_v60, 0  ;;  %v1055_v17 = vmul.f32 %v1050_v57, %v1734_v31  ;;  %v291_v21 = vmul.f32 %v287_v55, %v1721_v28 }
  0xda   :  { %v296_v19 = vadd.f32 %v294_v2, %v289_v62  ;;  %v299_v4 = vadd.f32 %v294_v2, %v292_v3  ;;  %v297_v20 = vadd.f32 %v294_v2, %v290_v6  ;;  %v2148_v23 = vadd.f32 %v1057_v7, %v1052_v9 }
  0xdb   :  { %v2150_v27 = vadd.f32 %v1057_v7, %v1053_v10  ;;  %v2152_v24 = vadd.f32 %v1057_v7, %v1054_v11  ;;  %v2154_v25 = vadd.f32 %v1057_v7, %v1055_v17  ;;  %v298_v33 = vadd.f32 %v294_v2, %v291_v21 }
  0xdc   :  { %v300_v30 = vmax.f32 %v296_v19, 0.0  ;;  %v303_v32 = vmax.f32 %v299_v4, 0.0  ;;  %v301_v31 = vmax.f32 %v297_v20, 0.0 }
  0xdd   :  { %v302_v41 = vmax.f32 %v298_v33, 0.0 }
  0xde   :  { %395 = vmatmul.f32.vlgmr.msra.gmra.mxu2 %v300_v30  ;;  %v304_v28 = vrot.slane %v300_v30, 7  ;;  %v307_v34 = vrot.slane %v303_v32, 7  ;;  %v325_v35 = vrot.slane %v300_v30, 1  ;;  %v326_v37 = vrot.slane %v301_v31, 1 }
  0xdf   :  { %1374 = vmatpush.msk.msra.mxu2 %vm1783_vm8, %v1573_v16  ;;  %v305_v42 = vrot.slane %v301_v31, 7  ;;  %v327_v44 = vrot.slane %v302_v41, 1  ;;  %v306_v18 = vrot.slane %v302_v41, 7  ;;  %v328_v22 = vrot.slane %v303_v32, 1 }
  0xe0   :  { %v312_v39 = vsel %vm308_vm4, %v307_v34, %v304_v28  ;;  %v332_v40 = vsel %vm329_vm5, %v325_v35, %v326_v37 }
  0xe1   :  { %1279 = vmatmul.msk.f32.vlgmr.msra.gmra.mxu3 %vm2667_vm6, %v312_v39  ;;  %470 = vmatmul.f32.vlgmr.msrb.gmra.mxu0 %v332_v40  ;;  %v311_v13 = vsel %vm308_vm4, %v304_v28, %v305_v42  ;;  %v331_v14 = vsel %vm329_vm5, %v326_v37, %v327_v44  ;;  %v310_v29 = vsel %vm308_vm4, %v305_v42, %v306_v18 }
  0xe2   :  { %1375 = vmatpush.msk.msra.mxu2 %vm1797_vm9, %v1573_v16  ;;  %v330_v36 = vsel %vm329_vm5, %v327_v44, %v328_v22  ;;  %v309_v43 = vsel %vm308_vm4, %v306_v18, %v307_v34  ;;  %v333_v46 = vsel %vm329_vm5, %v328_v22, %v325_v35 }
  0xe4   :  { %1376 = vmatpush.msk.msra.mxu2 %vm1811_vm10, %v1573_v16 }
  0xe6   :  { %398 = vmatmul.f32.gmra.mxu2 %v301_v31 }
  0xe7   :  { %1377 = vmatpush.msk.msra.mxu2 %vm1823_vm11, %v1573_v16 }
  0xe9   :  { %427 = vmatmul.f32.gmra.mxu3 %v311_v13  ;;  %1299 = vmatmul.msk.f32.gmra.mxu0 %vm2666_vm0, %v331_v14  ;;  %vm2223_vm0 = vcmp.eq.s32.totalorder %v112_v26, 15 }
  0xea   :  { %1378 = vmatpush.msk.msra.mxu2 %vm1835_vm12, %v1573_v16  ;;  %vm1300_vm6 = vmneg %vm2223_vm0 }
  0xec   :  { %1379 = vmatpush.msk.msra.mxu2 %vm1847_vm13, %v1573_v16 }
  0xee   :  { %401 = vmatmul.f32.gmra.mxu2 %v302_v41 }
  0xef   :  { %1380 = vmatpush.msk.msra.mxu2 %vm1859_vm14, %v1573_v16 }
  0xf1   :  { %1281 = vmatmul.msk.f32.gmra.mxu3 %vm1280_vm2, %v310_v29  ;;  %476 = vmatmul.f32.gmra.mxu0 %v330_v36  ;;  %v1367_v29 = vld [vmem:[%s2658_s6 + $0x168] sm:$0xff]  ;;  %v1345_v36 = vld [vmem:[%s2658_s6 + $0xd8] sm:$0xff] }
  0xf2   :  { %1381 = vmatpush.msk.msra.mxu2 %vm1870_vm15, %v1573_v16  ;;  %721 = vmatpush.msra.mxu1 %v1367_v29 }
  0xf6   :  { %404 = vmatmul.f32.gmra.mxu2 %v303_v32 }
  0xf9   :  { %433 = vmatmul.f32.gmra.mxu3 %v309_v43  ;;  %1301 = vmatmul.msk.f32.gmra.mxu0 %vm1300_vm6, %v333_v46  ;;  %v623_v43 = vld [vmem:[%s2658_s6 + $0x60] sm:$0xff] }
  0xfa   :  { %v1366_v46 = vld [vmem:[%s2658_s6 + $0x160] sm:$0xff]  ;;  %676 = vmatpush.msra.mxu0 %v623_v43  ;;  %v1089_v43 = vld [vmem:[#allocation8 + $0xb0] sm:$0xff] }
  0xfb   :  { %722 = vmatpush.msra.mxu1 %v1366_v46  ;;  %v1087_v46 = vld [vmem:[#allocation8 + $0xa0] sm:$0xff] }
 0x15e   :  { %v471_v47 = vpop.f32.mrf.mxu0 }
 0x161   :  { %v396_v50 = vpop.f32.mrf.mxu2 }
 0x164   :  { %v425_v51 = vpop.f32.mrf.mxu3 }
 0x165   :  { %v426_v2 = vadd.f32 %v425_v51, %v396_v50  ;;  %v622_v50 = vld [vmem:[%s2658_s6 + $0x58] sm:$0xff] }
 0x166   :  { %v474_v55 = vpop.f32.mrf.mxu0  ;;  %v1365_v51 = vld [vmem:[%s2658_s6 + $0x158] sm:$0xff]  ;;  %677 = vmatpush.msra.mxu0 %v622_v50 }
 0x167   :  { %v2238_v7 = vadd.f32 %v471_v47, %v426_v2  ;;  %v1344_v47 = vld [vmem:[%s2658_s6 + $0xd0] sm:$0xff]  ;;  %723 = vmatpush.msra.mxu1 %v1365_v51  ;;  %v619_v2 = vld [vmem:[%s2658_s6 + $0x40] sm:$0xff] }
 0x168   :  { %v1085_v51 = vld [vmem:[#allocation8 + $0x90] sm:$0xff] }
 0x169   :  { %v399_v52 = vpop.f32.mrf.mxu2  ;;  %v496_v19 = vmul.f32 %v2238_v7, %v2238_v7 }
 0x16c   :  { %v428_v56 = vpop.f32.mrf.mxu3 }
 0x16d   :  { %v429_v60 = vadd.f32 %v428_v56, %v399_v52  ;;  %v1343_v52 = vld [vmem:[%s2658_s6 + $0xc8] sm:$0xff]  ;;  %v1364_v56 = vld [vmem:[%s2658_s6 + $0x150] sm:$0xff] }
 0x16e   :  { %v477_v61 = vpop.f32.mrf.mxu0  ;;  %724 = vmatpush.msra.mxu1 %v1364_v56 }
 0x16f   :  { %v2236_v6 = vadd.f32 %v474_v55, %v429_v60  ;;  %v621_v55 = vld [vmem:[%s2658_s6 + $0x50] sm:$0xff]  ;;  %v620_v60 = vld [vmem:[%s2658_s6 + $0x48] sm:$0xff] }
 0x170   :  { %678 = vmatpush.msra.mxu0 %v621_v55  ;;  %v553_v55 = vld [vmem:[#allocation5] sm:$0x1] }
 0x171   :  { %v402_v57 = vpop.f32.mrf.mxu2  ;;  %v497_v10 = vmul.f32 %v2236_v6, %v2236_v6  ;;  %v487_v4 = vadd.f32 %v2236_v6, %v2238_v7 }
 0x172   :  { %679 = vmatpush.msra.mxu0 %v620_v60  ;;  %v1081_v60 = vld [vmem:[#allocation8 + $0x70] sm:$0xff] }
 0x173   :  { %v500_v32 = vadd.f32 %v497_v10, %v496_v19  ;;  %v1340_v10 = vld [vmem:[%s2658_s6 + $0xb0] sm:$0xff]  ;;  %v1361_v19 = vld [vmem:[%s2658_s6 + $0x138] sm:$0xff] }
 0x174   :  { %v431_v62 = vpop.f32.mrf.mxu3  ;;  %680 = vmatpush.msra.mxu0 %v619_v2  ;;  %v566_v2 = vld [vmem:[#allocation7] sm:$0x1] }
 0x175   :  { %v432_v3 = vadd.f32 %v431_v62, %v402_v57  ;;  %v1342_v57 = vld [vmem:[%s2658_s6 + $0xc0] sm:$0xff]  ;;  %v1341_v62 = vld [vmem:[%s2658_s6 + $0xb8] sm:$0xff] }
 0x176   :  { %v480_v30 = vpop.f32.mrf.mxu0 }
 0x177   :  { %v2240_v9 = vadd.f32 %v477_v61, %v432_v3  ;;  %v1363_v61 = vld [vmem:[%s2658_s6 + $0x148] sm:$0xff]  ;;  %v1362_v3 = vld [vmem:[%s2658_s6 + $0x140] sm:$0xff] }
 0x178   :  { %725 = vmatpush.msra.mxu1 %v1363_v61 }
 0x179   :  { %v405_v11 = vpop.f32.mrf.mxu2  ;;  %v498_v20 = vmul.f32 %v2240_v9, %v2240_v9  ;;  %v488_v31 = vadd.f32 %v487_v4, %v2240_v9  ;;  %v1339_v4 = vld [vmem:[%s2658_s6 + $0xa8] sm:$0xff] }
 0x17a   :  { %726 = vmatpush.msra.mxu1 %v1362_v3 }
 0x17b   :  { %v501_v35 = vadd.f32 %v500_v32, %v498_v20  ;;  %v1338_v20 = vld [vmem:[%s2658_s6 + $0xa0] sm:$0xff]  ;;  %v616_v32 = vld [vmem:[%s2658_s6 + $0x28] sm:$0xff] }
 0x17c   :  { %v434_v17 = vpop.f32.mrf.mxu3  ;;  %727 = vmatpush.msra.mxu1 %v1361_v19  ;;  %v1075_v19 = vld [vmem:[#allocation8 + $0x40] sm:$0xff] }
 0x17d   :  { %v435_v21 = vadd.f32 %v434_v17, %v405_v11  ;;  %v618_v17 = vld [vmem:[%s2658_s6 + $0x38] sm:$0xff] }
 0x17e   :  { %681 = vmatpush.msra.mxu0 %v618_v17  ;;  %v1077_v17 = vld [vmem:[#allocation8 + $0x50] sm:$0xff] }
 0x17f   :  { %v2251_v33 = vadd.f32 %v480_v30, %v435_v21  ;;  %v617_v21 = vld [vmem:[%s2658_s6 + $0x30] sm:$0xff] }
 0x180   :  { %v1360_v30 = vld [vmem:[%s2658_s6 + $0x130] sm:$0xff]  ;;  %682 = vmatpush.msra.mxu0 %v617_v21 }
 0x181   :  { %v499_v28 = vmul.f32 %v2251_v33, %v2251_v33  ;;  %v489_v34 = vadd.f32 %v488_v31, %v2251_v33  ;;  %728 = vmatpush.msra.mxu1 %v1360_v30 }
 0x182   :  { %683 = vmatpush.msra.mxu0 %v616_v32  ;;  %v1073_v32 = vld [vmem:[#allocation8 + $0x30] sm:$0xff] }
 0x183   :  { %v490_v37 = vrot.slane %v489_v34, 4  ;;  %v502_v38 = vadd.f32 %v501_v35, %v499_v28  ;;  %v1337_v28 = vld [vmem:[%s2658_s6 + $0x98] sm:$0xff]  ;;  %v615_v35 = vld [vmem:[%s2658_s6 + $0x20] sm:$0xff] }
 0x184   :  { %684 = vmatpush.msra.mxu0 %v615_v35 }
 0x185   :  { %v491_v39 = vadd.f32 %v490_v37, %v489_v34  ;;  %v503_v40 = vrot.slane %v502_v38, 4  ;;  %v1359_v34 = vld [vmem:[%s2658_s6 + $0x128] sm:$0xff]  ;;  %v1358_v37 = vld [vmem:[%s2658_s6 + $0x120] sm:$0xff] }
 0x186   :  { %729 = vmatpush.msra.mxu1 %v1359_v34 }
 0x187   :  { %v492_v41 = vrot.slane %v491_v39, 2  ;;  %v504_v42 = vadd.f32 %v503_v40, %v502_v38  ;;  %v1336_v38 = vld [vmem:[%s2658_s6 + $0x90] sm:$0xff]  ;;  %v614_v40 = vld [vmem:[%s2658_s6 + $0x18] sm:$0xff] }
 0x188   :  { %730 = vmatpush.msra.mxu1 %v1358_v37  ;;  %685 = vmatpush.msra.mxu0 %v614_v40  ;;  %v1071_v37 = vld [vmem:[#allocation8 + $0x20] sm:$0xff] }
 0x189   :  { %v493_v44 = vadd.f32 %v492_v41, %v491_v39  ;;  %v505_v45 = vrot.slane %v504_v42, 2  ;;  %v1357_v41 = vld [vmem:[%s2658_s6 + $0x118] sm:$0xff] }
 0x18a   :  { %731 = vmatpush.msra.mxu1 %v1357_v41 }
 0x18b   :  { %v494_v13 = vrot.slane %v493_v44, 1  ;;  %v506_v14 = vadd.f32 %v505_v45, %v504_v42  ;;  %v1335_v45 = vld [vmem:[%s2658_s6 + $0x88] sm:$0xff] }
 0x18d   :  { %v495_v18 = vadd.f32 %v494_v13, %v493_v44  ;;  %v507_v22 = vrot.slane %v506_v14, 1  ;;  %v613_v13 = vld [vmem:[%s2658_s6 + $0x10] sm:$0xff] }
 0x18e   :  { %686 = vmatpush.msra.mxu0 %v613_v13 }
 0x18f   :  { %525 = vmatmul.f32.vlgmr.msrb.gmra.mxu1 %v495_v18  ;;  %v508_v26 = vadd.f32 %v507_v22, %v506_v14  ;;  %v1356_v14 = vld [vmem:[%s2658_s6 + $0x110] sm:$0xff]  ;;  %v1334_v22 = vld [vmem:[%s2658_s6 + $0x80] sm:$0xff] }
 0x190   :  { %732 = vmatpush.msra.mxu1 %v1356_v14  ;;  %687 = vmatpush.msra.mxu0 %v612_v49 }
 0x191   :  { %546 = vmatmul.f32.vlgmr.msrb.gmra.mxu2 %v508_v26 }
 0x192   :  { %1383 = vmatpush.msk.msrb.mxu2 %vm1783_vm8, %v1573_v16  ;;  %733 = vmatpush.msra.mxu1 %v1355_v54 }
 0x193   :  { %688 = vmatpush.msra.mxu0 %v611_v59 }
 0x194   :  { %1384 = vmatpush.msk.msrb.mxu2 %vm1797_vm9, %v1573_v16  ;;  %734 = vmatpush.msra.mxu1 %v1354_v63 }
 0x196   :  { %1385 = vmatpush.msk.msrb.mxu2 %vm1811_vm10, %v1573_v16 }
 0x198   :  { %1386 = vmatpush.msk.msrb.mxu2 %vm1823_vm11, %v1573_v16  ;;  %vm2708_vm11 = vmneg %vm2128_vm3 }
 0x19a   :  { %1387 = vmatpush.msk.msrb.mxu2 %vm1835_vm12, %v1573_v16  ;;  %vm2709_vm12 = vmneg %vm2177_vm7 }
 0x19c   :  { %1388 = vmatpush.msk.msrb.mxu2 %vm1847_vm13, %v1573_v16  ;;  %vm752_vm13 = vcmask 523264  }
 0x19e   :  { %1389 = vmatpush.msk.msrb.mxu2 %vm1859_vm14, %v1573_v16 }
 0x1a0   :  { %1390 = vmatpush.msk.msrb.mxu2 %vm1870_vm15, %v1573_v16  ;;  %v1347_v16 = vld [vmem:[%s2658_s6 + $0xe8] sm:$0xff] }
 0x1a1   :  { %646 = vmatpush.msrb.mxu3 %v1347_v16  ;;  %v1097_v16 = vld [vmem:[#allocation8 + $0xf0] sm:$0xff] }
 0x1a2   :  { %1099 = vmatpush.msrb.mxu1 %v1097_v16 }
 0x1a3   :  { %647 = vmatpush.msrb.mxu3 %v1346_v12  ;;  %v1093_v12 = vld [vmem:[#allocation8 + $0xd0] sm:$0xff] }
 0x1a4   :  { %1100 = vmatpush.msrb.mxu1 %v1095_v5 }
 0x1a5   :  { %648 = vmatpush.msrb.mxu3 %v1345_v36 }
 0x1a6   :  { %1101 = vmatpush.msrb.mxu1 %v1093_v12 }
 0x1a7   :  { %649 = vmatpush.msrb.mxu3 %v1344_v47 }
 0x1a8   :  { %1102 = vmatpush.msrb.mxu1 %v1091_v15 }
 0x1a9   :  { %650 = vmatpush.msrb.mxu3 %v1343_v52  ;;  %v1083_v52 = vld [vmem:[#allocation8 + $0x80] sm:$0xff] }
 0x1aa   :  { %1103 = vmatpush.msrb.mxu1 %v1089_v43  ;;  %v1063_v43 = vmax.f32 %v2148_v23, 0.0 }
 0x1ab   :  { %651 = vmatpush.msrb.mxu3 %v1342_v57 }
 0x1ac   :  { %1104 = vmatpush.msrb.mxu1 %v1087_v46  ;;  %v1064_v46 = vmax.f32 %v2150_v27, 0.0 }
 0x1ad   :  { %652 = vmatpush.msrb.mxu3 %v1341_v62  ;;  %v1079_v62 = vld [vmem:[#allocation8 + $0x60] sm:$0xff] }
 0x1ae   :  { %1105 = vmatpush.msrb.mxu1 %v1085_v51 }
 0x1af   :  { %653 = vmatpush.msrb.mxu3 %v1340_v10 }
 0x1b0   :  { %1106 = vmatpush.msrb.mxu1 %v1083_v52 }
 0x1b1   :  { %654 = vmatpush.msrb.mxu3 %v1339_v4 }
 0x1b2   :  { %1107 = vmatpush.msrb.mxu1 %v1081_v60 }
 0x1b3   :  { %655 = vmatpush.msrb.mxu3 %v1338_v20 }
 0x1b4   :  { %1108 = vmatpush.msrb.mxu1 %v1079_v62 }
 0x1b5   :  { %656 = vmatpush.msrb.mxu3 %v1337_v28 }
 0x1b6   :  { %1109 = vmatpush.msrb.mxu1 %v1077_v17 }
 0x1b7   :  { %657 = vmatpush.msrb.mxu3 %v1336_v38 }
 0x1b8   :  { %1110 = vmatpush.msrb.mxu1 %v1075_v19 }
 0x1b9   :  { %658 = vmatpush.msrb.mxu3 %v1335_v45 }
 0x1ba   :  { %1111 = vmatpush.msrb.mxu1 %v1073_v32 }
 0x1bb   :  { %659 = vmatpush.msrb.mxu3 %v1334_v22 }
 0x1bc   :  { %1112 = vmatpush.msrb.mxu1 %v1071_v37 }
 0x20c   :  { %v526_v11 = vpop.f32.mrf.mxu1 }
 0x20d   :  { %v2379_v31 = vmul.f32 0.001953125, %v526_v11 }
 0x20f   :  { %v551_v42 = vmul.f32 %v2379_v31, %v2379_v31 }
 0x214   :  { %v547_v39 = vpop.f32.mrf.mxu2 }
 0x215   :  { %v550_v44 = vmul.f32 0.001953125, %v547_v39 }
 0x217   :  { %v552_v18 = vsub.f32 %v550_v44, %v551_v42  ;;  %v1069_v42 = vld [vmem:[#allocation8 + $0x10] sm:$0xff] }
 0x218   :  { %1113 = vmatpush.msrb.mxu1 %v1069_v42 }
 0x219   :  { %v554_v26 = vadd.f32 1e-05, %v552_v18  ;;  %v1067_v18 = vld [vmem:[#allocation8] sm:$0xff] }
 0x21a   :  { %1114 = vmatpush.msrb.mxu1 %v1067_v18 }
 0x21b   :  { %1433 = vrsqrt.f32 %v554_v26  ;;  %vm561_vm9 = vweird.f32 %v554_v26 }
 0x221   :  { %v1434_v8 = vpop.eup %1433 }
 0x222   :  { %v556_v29 = vmul.f32 %v1434_v8, %v554_v26  ;;  %vm562_vm8 = vweird.f32 %v1434_v8 }
 0x223   :  { %vm563_vm10 = vmor %vm561_vm9, %vm562_vm8 }
 0x224   :  { %v557_v36 = vmul.f32 %v1434_v8, %v556_v29 }
 0x226   :  { %v558_v47 = vmul.f32 0.5, %v557_v36 }
 0x228   :  { %v559_v50 = vsub.f32 1.5, %v558_v47  ;;  %v1065_v47 = vmax.f32 %v2152_v24, 0.0 }
 0x22a   :  { %v560_v56 = vmul.f32 %v1434_v8, %v559_v50  ;;  %v1066_v50 = vmax.f32 %v2154_v25, 0.0 }
 0x22c   :  { %v564_v57 = vsel %vm563_vm10, %v1434_v8, %v560_v56 }
 0x22d   :  { %v565_v61 = vmul.f32 %v564_v57, %v553_v55 }
 0x22f   :  { %v567_v3 = vmul.f32 %v565_v61, %v2379_v31  ;;  %v570_v10 = vperm.slane %v565_v61, 0 }
 0x231   :  { %v568_v11 = vsub.f32 %v566_v2, %v567_v3  ;;  %v572_v4 = vmul.f32 %v570_v10, %v2238_v7  ;;  %v575_v21 = vmul.f32 %v570_v10, %v2251_v33  ;;  %v573_v30 = vmul.f32 %v570_v10, %v2236_v6 }
 0x232   :  { %v574_v31 = vmul.f32 %v570_v10, %v2240_v9 }
 0x233   :  { %v577_v20 = vperm.slane %v568_v11, 0 }
 0x235   :  { %v579_v28 = vadd.f32 %v577_v20, %v572_v4  ;;  %v582_v34 = vadd.f32 %v577_v20, %v575_v21  ;;  %v580_v35 = vadd.f32 %v577_v20, %v573_v30  ;;  %v581_v41 = vadd.f32 %v577_v20, %v574_v31 }
 0x237   :  { %v583_v38 = vmax.f32 %v579_v28, 0.0  ;;  %v586_v39 = vmax.f32 %v582_v34, 0.0  ;;  %v584_v40 = vmax.f32 %v580_v35, 0.0  ;;  %v585_v49 = vmax.f32 %v581_v41, 0.0 }
 0x239   :  { %v587_v44 = vrot.slane %v583_v38, 7  ;;  %660 = vmatmul.f32.vlgmr.msrb.gmra.mxu3 %v583_v38  ;;  %v590_v45 = vrot.slane %v586_v39, 7  ;;  %v599_v13 = vrot.slane %v583_v38, 1  ;;  %v600_v14 = vrot.slane %v584_v40, 1 }
 0x23a   :  { %v588_v54 = vrot.slane %v584_v40, 7  ;;  %v601_v59 = vrot.slane %v585_v49, 1  ;;  %v589_v5 = vrot.slane %v585_v49, 7  ;;  %v602_v8 = vrot.slane %v586_v39, 1 }
 0x23b   :  { %v594_v22 = vsel %vm308_vm4, %v590_v45, %v587_v44  ;;  %v605_v26 = vsel %vm329_vm5, %v599_v13, %v600_v14 }
 0x23c   :  { %1351 = vmatmul.msk.f32.vlgmr.msra.gmra.mxu0 %vm2708_vm11, %v594_v22  ;;  %735 = vmatmul.f32.vlgmr.msra.gmra.mxu1 %v605_v26  ;;  %v593_v63 = vsel %vm308_vm4, %v587_v44, %v588_v54  ;;  %v604_v16 = vsel %vm329_vm5, %v600_v14, %v601_v59  ;;  %v592_v12 = vsel %vm308_vm4, %v588_v54, %v589_v5 }
 0x23d   :  { %v603_v15 = vsel %vm329_vm5, %v601_v59, %v602_v8  ;;  %v591_v29 = vsel %vm308_vm4, %v589_v5, %v590_v45  ;;  %v606_v36 = vsel %vm329_vm5, %v602_v8, %v599_v13 }
 0x241   :  { %663 = vmatmul.f32.gmra.mxu3 %v584_v40 }
 0x244   :  { %692 = vmatmul.f32.gmra.mxu0 %v593_v63  ;;  %1371 = vmatmul.msk.f32.gmra.mxu1 %vm2709_vm12, %v604_v16 }
 0x249   :  { %666 = vmatmul.f32.gmra.mxu3 %v585_v49 }
 0x24c   :  { %1353 = vmatmul.msk.f32.gmra.mxu0 %vm1280_vm2, %v592_v12  ;;  %741 = vmatmul.f32.gmra.mxu1 %v603_v15 }
 0x251   :  { %669 = vmatmul.f32.gmra.mxu3 %v586_v39 }
 0x254   :  { %698 = vmatmul.f32.gmra.mxu0 %v591_v29  ;;  %1373 = vmatmul.msk.f32.gmra.mxu1 %vm1300_vm6, %v606_v36 }
 0x25c   :  { %1115 = vmatmul.f32.vlgmr.msrb.gmra.mxu1 %v1063_v43 }
 0x264   :  { %1118 = vmatmul.f32.gmra.mxu1 %v1064_v46 }
 0x26c   :  { %1121 = vmatmul.f32.gmra.mxu1 %v1065_v47 }
 0x274   :  { %1124 = vmatmul.f32.gmra.mxu1 %v1066_v50 }
 0x2b9   :  { %v690_v51 = vpop.f32.mrf.mxu0  ;;  %v736_v52 = vpop.f32.mrf.mxu1 }
 0x2bc   :  { %v661_v55 = vpop.f32.mrf.mxu3 }
 0x2bd   :  { %v691_v3 = vadd.f32 %v690_v51, %v661_v55 }
 0x2bf   :  { %v2475_v19 = vadd.f32 %v736_v52, %v691_v3 }
 0x2c1   :  { %v693_v56 = vpop.f32.mrf.mxu0  ;;  %v739_v57 = vpop.f32.mrf.mxu1  ;;  %v766_v30 = vmul.f32 %v2475_v19, %v2475_v19  ;;  %v753_v31 = vsel %vm752_vm13, %v2475_v19, 0.0 }
 0x2c3   :  { %v770_v41 = vsel %vm752_vm13, %v766_v30, 0.0  ;;  %v1414_v30 = vld [vmem:[%s2661_s9 + $0xb0] sm:$0xff] }
 0x2c4   :  { %v664_v60 = vpop.f32.mrf.mxu3 }
 0x2c5   :  { %v694_v61 = vadd.f32 %v693_v56, %v664_v60 }
 0x2c7   :  { %v2473_v11 = vadd.f32 %v739_v57, %v694_v61 }
 0x2c9   :  { %v742_v62 = vpop.f32.mrf.mxu1  ;;  %v696_v2 = vpop.f32.mrf.mxu0  ;;  %v767_v20 = vmul.f32 %v2473_v11, %v2473_v11  ;;  %v754_v32 = vsel %vm752_vm13, %v2473_v11, 0.0 }
 0x2ca   :  { %v755_v40 = vadd.f32 %v754_v32, %v753_v31  ;;  %v1396_v32 = vld [vmem:[%s2661_s9 + $0x60] sm:$0xff]  ;;  %v1394_v31 = vld [vmem:[%s2661_s9 + $0x50] sm:$0xff] }
 0x2cb   :  { %v771_v37 = vsel %vm752_vm13, %v767_v20, 0.0  ;;  %v898_v20 = vld [vmem:[%s2661_s9 + $0x38] sm:$0xff] }
 0x2cc   :  { %v667_v10 = vpop.f32.mrf.mxu3  ;;  %v772_v45 = vadd.f32 %v771_v37, %v770_v41 }
 0x2cd   :  { %v697_v17 = vadd.f32 %v696_v2, %v667_v10  ;;  %v1399_v10 = vld [vmem:[%s2661_s9 + $0x78] sm:$0xff] }
 0x2ce   :  { %928 = vmatpush.msra.mxu3 %v1399_v10  ;;  %v1080_v10 = vld [vmem:[#allocation8 + $0x68] sm:$0xff] }
 0x2cf   :  { %v2477_v4 = vadd.f32 %v742_v62, %v697_v17  ;;  %v1398_v17 = vld [vmem:[%s2661_s9 + $0x70] sm:$0xff] }
 0x2d0   :  { %929 = vmatpush.msra.mxu3 %v1398_v17 }
 0x2d1   :  { %v745_v21 = vpop.f32.mrf.mxu1  ;;  %v768_v28 = vmul.f32 %v2477_v4, %v2477_v4  ;;  %v699_v34 = vpop.f32.mrf.mxu0  ;;  %v756_v38 = vsel %vm752_vm13, %v2477_v4, 0.0 }
 0x2d2   :  { %v757_v13 = vadd.f32 %v756_v38, %v755_v40  ;;  %v1412_v38 = vld [vmem:[%s2661_s9 + $0xa0] sm:$0xff] }
 0x2d3   :  { %v773_v42 = vsel %vm752_vm13, %v768_v28, 0.0  ;;  %v897_v28 = vld [vmem:[%s2661_s9 + $0x30] sm:$0xff]  ;;  %v895_v40 = vld [vmem:[%s2661_s9 + $0x20] sm:$0xff] }
 0x2d4   :  { %v670_v35 = vpop.f32.mrf.mxu3  ;;  %v774_v26 = vadd.f32 %v773_v42, %v772_v45  ;;  %v1411_v45 = vld [vmem:[%s2661_s9 + $0x98] sm:$0xff] }
 0x2d5   :  { %v700_v39 = vadd.f32 %v699_v34, %v670_v35  ;;  %v1395_v34 = vld [vmem:[%s2661_s9 + $0x58] sm:$0xff]  ;;  %v1413_v35 = vld [vmem:[%s2661_s9 + $0xa8] sm:$0xff] }
 0x2d7   :  { %v2494_v44 = vadd.f32 %v745_v21, %v700_v39  ;;  %v896_v39 = vld [vmem:[%s2661_s9 + $0x28] sm:$0xff] }
 0x2d9   :  { %v758_v14 = vsel %vm752_vm13, %v2494_v44, 0.0  ;;  %v769_v18 = vmul.f32 %v2494_v44, %v2494_v44  ;;  %v1116_v22 = vpop.f32.mrf.mxu1 }
 0x2da   :  { %v759_v49 = vadd.f32 %v758_v14, %v757_v13  ;;  %v1177_v54 = vadd.f32 %v1116_v22, %v2238_v7  ;;  %v1393_v13 = vld [vmem:[%s2661_s9 + $0x48] sm:$0xff]  ;;  %v894_v14 = vld [vmem:[%s2661_s9 + $0x18] sm:$0xff]  ;;  %v1410_v22 = vld [vmem:[%s2661_s9 + $0x90] sm:$0xff] }
 0x2db   :  { %v775_v59 = vsel %vm752_vm13, %v769_v18, 0.0 }
 0x2dc   :  { %v760_v63 = vrot.slane %v759_v49, 4  ;;  %v776_v16 = vadd.f32 %v775_v59, %v774_v26  ;;  %1185 = vst [vmem:[#allocation10] sm:$0xff] %v1177_v54  ;;  %v1392_v26 = vld [vmem:[%s2661_s9 + $0x40] sm:$0xff]  ;;  %v1409_v59 = vld [vmem:[%s2661_s9 + $0x88] sm:$0xff] }
 0x2de   :  { %v761_v5 = vadd.f32 %v760_v63, %v759_v49  ;;  %v777_v8 = vrot.slane %v776_v16, 4  ;;  %v893_v49 = vld [vmem:[%s2661_s9 + $0x10] sm:$0xff]  ;;  %v1098_v63 = vld [vmem:[#allocation8 + $0xf8] sm:$0xff] }
 0x2e0   :  { %v762_v12 = vrot.slane %v761_v5, 2  ;;  %v778_v15 = vadd.f32 %v777_v8, %v776_v16  ;;  %v892_v16 = vld [vmem:[%s2661_s9 + $0x8] sm:$0xff]  ;;  %v891_v8 = vld [vmem:[%s2661_s9] sm:$0xff] }
 0x2e1   :  { %v1119_v29 = vpop.f32.mrf.mxu1 }
 0x2e2   :  { %v1179_v36 = vadd.f32 %v1119_v29, %v2236_v6  ;;  %v763_v51 = vadd.f32 %v762_v12, %v761_v5  ;;  %v779_v52 = vrot.slane %v778_v15, 2  ;;  %v1408_v5 = vld [vmem:[%s2661_s9 + $0x80] sm:$0xff]  ;;  %v1096_v12 = vld [vmem:[#allocation8 + $0xe8] sm:$0xff] }
 0x2e3   :  { %v1092_v29 = vld [vmem:[#allocation8 + $0xc8] sm:$0xff] }
 0x2e4   :  { %1187 = vst [vmem:[#allocation10 + $0x10] sm:$0xff] %v1179_v36  ;;  %v764_v55 = vrot.slane %v763_v51, 1  ;;  %v780_v57 = vadd.f32 %v779_v52, %v778_v15  ;;  %v1094_v15 = vld [vmem:[#allocation8 + $0xd8] sm:$0xff] }
 0x2e6   :  { %v765_v56 = vadd.f32 %v764_v55, %v763_v51  ;;  %v781_v61 = vrot.slane %v780_v57, 1  ;;  %v1090_v51 = vld [vmem:[#allocation8 + $0xb8] sm:$0xff] }
 0x2e8   :  { %1382 = vmatmul.msk.f32.vlgmr.msra.gmra.mxu2 %vm752_vm13, %v765_v56  ;;  %v782_v62 = vadd.f32 %v781_v61, %v780_v57  ;;  %v1088_v56 = vld [vmem:[#allocation8 + $0xa8] sm:$0xff]  ;;  %v1086_v57 = vld [vmem:[#allocation8 + $0x98] sm:$0xff] }
 0x2e9   :  { %v1122_v7 = vpop.f32.mrf.mxu1  ;;  %969 = vmatpush.msra.mxu2 %v898_v20 }
 0x2ea   :  { %v1181_v60 = vadd.f32 %v1122_v7, %v2240_v9  ;;  %v1415_v9 = vld [vmem:[%s2661_s9 + $0xb8] sm:$0xff] }
 0x2eb   :  { %1019 = vmatpush.msrb.mxu0 %v1415_v9  ;;  %970 = vmatpush.msra.mxu2 %v897_v28  ;;  %v1078_v9 = vld [vmem:[#allocation8 + $0x58] sm:$0xff] }
 0x2ec   :  { %1189 = vst [vmem:[#allocation10 + $0x20] sm:$0xff] %v1181_v60  ;;  %v1084_v60 = vld [vmem:[#allocation8 + $0x88] sm:$0xff] }
 0x2ed   :  { %1020 = vmatpush.msrb.mxu0 %v1414_v30  ;;  %971 = vmatpush.msra.mxu2 %v896_v39 }
 0x2ef   :  { %1021 = vmatpush.msrb.mxu0 %v1413_v35  ;;  %972 = vmatpush.msra.mxu2 %v895_v40  ;;  %v1072_v40 = vld [vmem:[#allocation8 + $0x28] sm:$0xff] }
 0x2f0   :  { %1391 = vmatmul.msk.f32.vlgmr.msrb.gmra.mxu2 %vm752_vm13, %v782_v62  ;;  %v1082_v62 = vld [vmem:[#allocation8 + $0x78] sm:$0xff] }
 0x2f1   :  { %v1125_v2 = vpop.f32.mrf.mxu1  ;;  %1022 = vmatpush.msrb.mxu0 %v1412_v38  ;;  %973 = vmatpush.msra.mxu2 %v894_v14 }
 0x2f2   :  { %v1183_v3 = vadd.f32 %v1125_v2, %v2251_v33  ;;  %v1397_v33 = vld [vmem:[%s2661_s9 + $0x68] sm:$0xff]  ;;  %v833_v2 = vld [vmem:[%s2659_s7] sm:$0x1]  ;;  %s1574_s7 = smov 64  }
 0x2f3   :  { %930 = vmatpush.msra.mxu3 %v1397_v33  ;;  %1023 = vmatpush.msrb.mxu0 %v1411_v45  ;;  %v846_v33 = vld [vmem:[%s2660_s8] sm:$0x1]  ;;  %s1575_s8 = smov [#allocation10]  }
 0x2f4   :  { %1191 = vst [vmem:[#allocation10 + $0x30] sm:$0xff] %v1183_v3  ;;  %974 = vmatpush.msra.mxu2 %v893_v49  ;;  %s1197_s2 = sshll.u32 %s1575_s8, 4  ;;  %s1198_s2 = int_to_ptr.vmem [resolvable:$true] %s1197_s2 }
 0x2f5   :  { %931 = vmatpush.msra.mxu3 %v1396_v32  ;;  %1024 = vmatpush.msrb.mxu0 %v1410_v22  ;;  %v1076_v32 = vld [vmem:[#allocation8 + $0x48] sm:$0xff] }
 0x2f6   :  { %975 = vmatpush.msra.mxu2 %v892_v16 }
 0x2f7   :  { %932 = vmatpush.msra.mxu3 %v1395_v34  ;;  %1025 = vmatpush.msrb.mxu0 %v1409_v59  ;;  %v1074_v34 = vld [vmem:[#allocation8 + $0x38] sm:$0xff] }
 0x2f8   :  { %976 = vmatpush.msra.mxu2 %v891_v8 }
 0x2f9   :  { %933 = vmatpush.msra.mxu3 %v1394_v31  ;;  %1026 = vmatpush.msrb.mxu0 %v1408_v5 }
 0x2fb   :  { %934 = vmatpush.msra.mxu3 %v1393_v13  ;;  %v1070_v13 = vld [vmem:[#allocation8 + $0x18] sm:$0xff] }
 0x2fd   :  { %935 = vmatpush.msra.mxu3 %v1392_v26  ;;  %v1068_v26 = vld [vmem:[#allocation8 + $0x8] sm:$0xff] }
 0x2ff   :  { %1128 = vmatpush.msrb.mxu3 %v1098_v63 }
 0x301   :  { %1129 = vmatpush.msrb.mxu3 %v1096_v12 }
 0x303   :  { %1130 = vmatpush.msrb.mxu3 %v1094_v15 }
 0x305   :  { %1131 = vmatpush.msrb.mxu3 %v1092_v29 }
 0x307   :  { %1132 = vmatpush.msrb.mxu3 %v1090_v51 }
 0x309   :  { %1133 = vmatpush.msrb.mxu3 %v1088_v56 }
 0x30b   :  { %1134 = vmatpush.msrb.mxu3 %v1086_v57 }
 0x30d   :  { %1135 = vmatpush.msrb.mxu3 %v1084_v60 }
 0x30f   :  { %1136 = vmatpush.msrb.mxu3 %v1082_v62 }
 0x311   :  { %1137 = vmatpush.msrb.mxu3 %v1080_v10 }
 0x313   :  { %1138 = vmatpush.msrb.mxu3 %v1078_v9 }
 0x315   :  { %1139 = vmatpush.msrb.mxu3 %v1076_v32 }
 0x317   :  { %1140 = vmatpush.msrb.mxu3 %v1074_v34 }
 0x319   :  { %1141 = vmatpush.msrb.mxu3 %v1072_v40 }
 0x31b   :  { %1142 = vmatpush.msrb.mxu3 %v1070_v13 }
 0x31d   :  { %1143 = vmatpush.msrb.mxu3 %v1068_v26 }
 0x36b   :  { %v803_v6 = vpop.f32.mrf.mxu2 }
 0x36c   :  { %v2522_v21 = vmul.f32 0.001953125, %v803_v6 }
 0x36e   :  { %v831_v41 = vmul.f32 %v2522_v21, %v2522_v21 }
 0x373   :  { %v827_v37 = vpop.f32.mrf.mxu2 }
 0x374   :  { %v830_v42 = vmul.f32 0.001953125, %v827_v37 }
 0x376   :  { %v832_v18 = vsub.f32 %v830_v42, %v831_v41 }
 0x378   :  { %v834_v54 = vadd.f32 1e-05, %v832_v18 }
 0x37a   :  { %1435 = vrsqrt.f32 %v834_v54  ;;  %vm841_vm15 = vweird.f32 %v834_v54 }
 0x380   :  { %v1436_v36 = vpop.eup %1435 }
 0x381   :  { %v836_v52 = vmul.f32 %v1436_v36, %v834_v54  ;;  %vm842_vm14 = vweird.f32 %v1436_v36 }
 0x382   :  { %vm843_vm6 = vmor %vm841_vm15, %vm842_vm14 }
 0x383   :  { %v837_v55 = vmul.f32 %v1436_v36, %v836_v52 }
 0x385   :  { %v838_v7 = vmul.f32 0.5, %v837_v55 }
 0x387   :  { %v839_v61 = vsub.f32 1.5, %v838_v7 }
 0x389   :  { %v840_v3 = vmul.f32 %v1436_v36, %v839_v61 }
 0x38b   :  { %v844_v6 = vsel %vm843_vm6, %v1436_v36, %v840_v3 }
 0x38c   :  { %v845_v17 = vmul.f32 %v844_v6, %v833_v2 }
 0x38e   :  { %v847_v20 = vmul.f32 %v845_v17, %v2522_v21  ;;  %v850_v30 = vperm.slane %v845_v17, 0 }
 0x390   :  { %v848_v28 = vsub.f32 %v846_v33, %v847_v20  ;;  %v852_v35 = vmul.f32 %v850_v30, %v2475_v19  ;;  %v853_v37 = vmul.f32 %v850_v30, %v2473_v11  ;;  %v855_v38 = vmul.f32 %v850_v30, %v2494_v44 }
 0x391   :  { %v854_v39 = vmul.f32 %v850_v30, %v2477_v4 }
 0x392   :  { %v857_v31 = vperm.slane %v848_v28, 0 }
 0x394   :  { %v859_v41 = vadd.f32 %v857_v31, %v852_v35  ;;  %v860_v42 = vadd.f32 %v857_v31, %v853_v37  ;;  %v862_v21 = vadd.f32 %v857_v31, %v855_v38  ;;  %v861_v45 = vadd.f32 %v857_v31, %v854_v39 }
 0x396   :  { %v863_v14 = vmax.f32 %v859_v41, 0.0  ;;  %v864_v18 = vmax.f32 %v860_v42, 0.0  ;;  %v866_v22 = vmax.f32 %v862_v21, 0.0  ;;  %v865_v49 = vmax.f32 %v861_v45, 0.0 }
 0x398   :  { %1400 = vmatmul.msk.f32.vlgmr.msra.gmra.mxu3 %vm752_vm13, %v863_v14  ;;  %v879_v54 = vrot.slane %v863_v14, 1  ;;  %v880_v59 = vrot.slane %v864_v18, 1  ;;  %v867_v63 = vrot.slane %v863_v14, 7  ;;  %v870_v16 = vrot.slane %v866_v22, 7 }
 0x399   :  { %v881_v15 = vrot.slane %v865_v49, 1  ;;  %v868_v36 = vrot.slane %v864_v18, 7  ;;  %v869_v0 = vrot.slane %v865_v49, 7  ;;  %v882_v55 = vrot.slane %v866_v22, 1 }
 0x39a   :  { %v885_v5 = vsel %vm329_vm5, %v879_v54, %v880_v59  ;;  %v874_v8 = vsel %vm308_vm4, %v870_v16, %v867_v63 }
 0x39b   :  { %1416 = vmatmul.msk.f32.vlgmr.msrb.gmra.mxu0 %vm752_vm13, %v885_v5  ;;  %v875_v12 = vsel %vm2128_vm3, 0.0, %v874_v8  ;;  %v884_v29 = vsel %vm329_vm5, %v880_v59, %v881_v15  ;;  %v873_v52 = vsel %vm308_vm4, %v867_v63, %v868_v36  ;;  %v872_v56 = vsel %vm308_vm4, %v868_v36, %v869_v0 }
 0x39c   :  { %1404 = vmatmul.msk.f32.vlgmr.msra.gmra.mxu2 %vm752_vm13, %v875_v12  ;;  %v888_v51 = vsel %vm2177_vm7, 0.0, %v884_v29  ;;  %v883_v57 = vsel %vm329_vm5, %v881_v15, %v882_v55  ;;  %v877_v58 = vsel %vm2200_vm1, 0.0, %v872_v56  ;;  %v886_v7 = vsel %vm329_vm5, %v882_v55, %v879_v54 }
 0x39d   :  { %v890_v60 = vsel %vm2223_vm0, 0.0, %v886_v7  ;;  %v871_v61 = vsel %vm308_vm4, %v869_v0, %v870_v16 }
 0x3a0   :  { %1401 = vmatmul.msk.f32.gmra.mxu3 %vm752_vm13, %v864_v18 }
 0x3a3   :  { %1417 = vmatmul.msk.f32.gmra.mxu0 %vm752_vm13, %v888_v51 }
 0x3a4   :  { %1405 = vmatmul.msk.f32.gmra.mxu2 %vm752_vm13, %v873_v52 }
 0x3a8   :  { %1402 = vmatmul.msk.f32.gmra.mxu3 %vm752_vm13, %v865_v49 }
 0x3ab   :  { %1418 = vmatmul.msk.f32.gmra.mxu0 %vm752_vm13, %v883_v57 }
 0x3ac   :  { %1406 = vmatmul.msk.f32.gmra.mxu2 %vm752_vm13, %v877_v58 }
 0x3b0   :  { %1403 = vmatmul.msk.f32.gmra.mxu3 %vm752_vm13, %v866_v22 }
 0x3b3   :  { %1419 = vmatmul.msk.f32.gmra.mxu0 %vm752_vm13, %v890_v60 }
 0x3b4   :  { %1407 = vmatmul.msk.f32.gmra.mxu2 %vm752_vm13, %v871_v61 }
 0x3b8   :  { %1144 = vmatmul.f32.vlgmr.msrb.gmra.mxu3 %v1063_v43 }
 0x3c0   :  { %1147 = vmatmul.f32.gmra.mxu3 %v1064_v46 }
 0x3c8   :  { %1150 = vmatmul.f32.gmra.mxu3 %v1065_v47 }
 0x3d0   :  { %1153 = vmatmul.f32.gmra.mxu3 %v1066_v50 }
 0x418   :  { %v1028_v53 = vpop.f32.mrf.mxu0 }
 0x41b   :  { %v937_v48 = vpop.f32.mrf.mxu3 }
 0x41f   :  { %v978_v62 = vpop.f32.mrf.mxu2 }
 0x420   :  { %v979_v2 = vadd.f32 %v978_v62, %v937_v48  ;;  %v1031_v6 = vpop.f32.mrf.mxu0 }
 0x422   :  { %v1040_v1 = vadd.f32 %v1028_v53, %v979_v2 }
 0x423   :  { %v940_v3 = vpop.f32.mrf.mxu3 }
 0x424   :  { %1161 = vrot.lane.b32.xlu0 %v1040_v1, %s1574_s7 }
 0x427   :  { %v981_v23 = vpop.f32.mrf.mxu2 }
 0x428   :  { %v982_v43 = vadd.f32 %v981_v23, %v940_v3  ;;  %v1034_v46 = vpop.f32.mrf.mxu0 }
 0x42a   :  { %v1041_v10 = vadd.f32 %v1031_v6, %v982_v43 }
 0x42b   :  { %v943_v27 = vpop.f32.mrf.mxu3 }
 0x42c   :  { %1163 = vrot.lane.b32.xlu0 %v1041_v10, %s1574_s7 }
 0x42f   :  { %v984_v24 = vpop.f32.mrf.mxu2 }
 0x430   :  { %v985_v47 = vadd.f32 %v984_v24, %v943_v27  ;;  %v1037_v33 = vpop.f32.mrf.mxu0 }
 0x432   :  { %v1042_v17 = vadd.f32 %v1034_v46, %v985_v47 }
 0x433   :  { %v946_v25 = vpop.f32.mrf.mxu3 }
 0x434   :  { %1165 = vrot.lane.b32.xlu1 %v1042_v17, %s1574_s7 }
 0x437   :  { %v987_v50 = vpop.f32.mrf.mxu2 }
 0x438   :  { %v988_v9 = vadd.f32 %v987_v50, %v946_v25 }
 0x43a   :  { %v1043_v20 = vadd.f32 %v1037_v33, %v988_v9 }
 0x43b   :  { %v1145_v30 = vpop.f32.mrf.mxu3 }
 0x43c   :  { %1167 = vrot.lane.b32.xlu1 %v1043_v20, %s1574_s7 }
 0x443   :  { %v1148_v35 = vpop.f32.mrf.mxu3 }
 0x44b   :  { %v1151_v39 = vpop.f32.mrf.mxu3 }
 0x453   :  { %v1154_v21 = vpop.f32.mrf.mxu3 }
 0x496   :  { %v1162_v32 = vpop.permute.xlu0 %1161 }
 0x497   :  { %v1173_v28 = vsel %vm752_vm13, %v2475_v19, %v1162_v32 }
 0x498   :  { %v1178_v34 = vadd.f32 %v1173_v28, %v1145_v30 }
 0x49a   :  { %1186 = vst [vmem:[#allocation10 + $0x8] sm:$0xff] %v1178_v34 }
 0x49e   :  { %v1164_v31 = vpop.permute.xlu0 %1163 }
 0x49f   :  { %v1174_v37 = vsel %vm752_vm13, %v2473_v11, %v1164_v31 }
 0x4a0   :  { %v1180_v38 = vadd.f32 %v1174_v37, %v1148_v35 }
 0x4a2   :  { %1188 = vst [vmem:[#allocation10 + $0x18] sm:$0xff] %v1180_v38 }
 0x4a6   :  { %v1166_v40 = vpop.permute.xlu1 %1165 }
 0x4a7   :  { %v1175_v41 = vsel %vm752_vm13, %v2477_v4, %v1166_v40 }
 0x4a8   :  { %v1182_v42 = vadd.f32 %v1175_v41, %v1151_v39 }
 0x4aa   :  { %1190 = vst [vmem:[#allocation10 + $0x28] sm:$0xff] %v1182_v42 }
 0x4ae   :  { %v1168_v19 = vpop.permute.xlu1 %1167 }
 0x4af   :  { %v1176_v11 = vsel %vm752_vm13, %v2494_v44, %v1168_v19 }
 0x4b0   :  { %v1184_v45 = vadd.f32 %v1176_v11, %v1154_v21 }
 0x4b2   :  { %1192 = vst [vmem:[#allocation10 + $0x38] sm:$0xff] %v1184_v45 }
 0x4b3   :  { %1205 = dma.vmem_to_hbm [thread:$0]  %s1198_s2, 1024, %s1200_s18, [#allocation4], %s1571_s28, %s1571_s28, %s1572_s29  }
 0x4b4   :  { %1563 = dma.done.wait [#allocation4], 1024  }
 0x4b5   :  { %1564 = vsyncadd [#allocation4], 4294966272 }
 0x4b6   :  { %1210 = vsyncpa [#allocation3], 1 }
 0x4b7   :  { %1211 = vsyncpa [#allocation6], 1 }
 0x4b8   :  { %1212 = vsyncpa [#allocation9], 1 }
 0x4b9   :  { %1213 = vsyncpa [#allocation4], 1 }

</bundles_post_ra>
